<compile_context>
chip_gen: v7x
topology: tpu7x:2x2x1
jax: 0.10.0
libtpu: 0.0.40
codegen_flags: <defaults>
</compile_context>

<pallas_src>
import functools

import jax
import jax.numpy as jnp
from jax.experimental import pallas as pl
from jax.experimental.pallas import tpu as pltpu

NUM_GROUPS = 32
EPS = 1e-6


# ---------------------------------------------------------------------------
# VMEM budgeting / tile selection (generation aware)
# ---------------------------------------------------------------------------
def _vmem_budget():
    cap = 128 * 1024 * 1024
    try:
        cap = int(pltpu.get_tpu_info().vmem_capacity_bytes)   # 64 MiB on v7x
    except Exception:
        pass
    limit = min(cap * 3 // 4, 100 * 1024 * 1024)   # scoped limit we request
    budget = int(limit * 0.55)                     # working-set target
    return limit, budget


def _per_col_bytes(cf, cz, hwz, e_in, identity):
    """Approx VMEM bytes needed per HW column of a streamed pass-2 tile."""
    cols = 2 * cf * e_in * 2          # f tile in + out tile, double-buffered
    cols += cf * 4 * 4                # f32 temporaries (f, norm, y, b)
    cols += 2 * cf * 4                # fused conv output yb (f32)
    if identity:
        cols += 2 * cz * e_in + cz * 4
    else:
        cols += 2 * 4                 # idx tile
        cols += hwz * e_in            # one-hot selection matrix column
        cols += cz * 4 + cz * e_in    # upsampled zq column
    return cols


def _pick_hw_tile(hw, per_col_bytes, budget, cap=2048):
    """Largest lane-dense tile fitting the budget; prefers exact divisors."""
    if hw < 128:
        return hw, False                                   # full extent, legal
    max_cols = max(128, (budget // max(per_col_bytes, 1)) // 128 * 128)
    max_t = min(cap, max_cols, (hw // 128) * 128)
    for t in range(max_t, 127, -128):
        if hw % t == 0:
            return t, False
    if hw <= min(cap, max_cols):
        return hw, False                                   # whole extent fits
    return max_t, True                                     # ragged last tile


# ---------------------------------------------------------------------------
# Shared in-kernel helpers
# ---------------------------------------------------------------------------
def _group_scale_shift(s, q, gb_ref, p_ref, pt_ref, denom):
    """Per-channel sums -> per-channel scale/shift with gamma/beta folded in."""
    gs = jnp.dot(pt_ref[...], s, preferred_element_type=jnp.float32)     # [G,1]
    gq = jnp.dot(pt_ref[...], q, preferred_element_type=jnp.float32)     # [G,1]
    mean = jnp.dot(p_ref[...], gs, preferred_element_type=jnp.float32) / denom
    ex2 = jnp.dot(p_ref[...], gq, preferred_element_type=jnp.float32) / denom
    var = jnp.maximum(ex2 - mean * mean, 0.0)      # clamp cancellation -> no NaN
    inv = jax.lax.rsqrt(var + EPS)
    gamma = gb_ref[0]                              # [Cf, 1]
    beta = gb_ref[1]
    scale = inv * gamma
    shift = beta - mean * scale
    return scale, shift


def _upsample_columns(zq, idx, hw_low):
    """Exact nearest-neighbour upsample along the flattened spatial (lane)
    axis via a one-hot selection matmul; MXU slack hides it under the DMA."""
    rows = jax.lax.broadcasted_iota(jnp.int32, (hw_low, idx.shape[-1]), 0)
    sel = (rows == idx).astype(zq.dtype)                                 # [hw, T]
    up = jnp.dot(zq, sel, preferred_element_type=jnp.float32)            # [Cz, T]
    return up.astype(zq.dtype)     # lossless: each column is an exact zq column


def _norm_conv_combine(f, zq, idx, scale, shift, w_ref, bias_ref, o_ref,
                       f_channels, hw_low):
    if idx is not None:
        zq = _upsample_columns(zq, idx, hw_low)
    # both 1x1 convs in a single MXU matmul: [2*Cf, Cz] @ [Cz, T]
    yb = jnp.dot(w_ref[...], zq, preferred_element_type=jnp.float32) + bias_ref[...]
    y = yb[:f_channels, :]
    b = yb[f_channels:, :]
    o_ref[0] = ((f * scale + shift) * y + b).astype(o_ref.dtype)


# ---------------------------------------------------------------------------
# Two-pass kernels
# ---------------------------------------------------------------------------
def _stats_kernel(f_ref, gb_ref, p_ref, pt_ref, scale_ref, shift_ref,
                  s_acc, q_acc, *, denom, hw_total, tile, ragged):
    t = pl.program_id(1)

    @pl.when(t == 0)
    def _():
        s_acc[...] = jnp.zeros_like(s_acc)
        q_acc[...] = jnp.zeros_like(q_acc)

    f = f_ref[0].astype(jnp.float32)                       # [Cf, T]
    if ragged:
        col = t * tile + jax.lax.broadcasted_iota(jnp.int32, (1, tile), 1)
        f = jnp.where(col < hw_total, f, 0.0)

    lane_chunks = tile // 128 if (tile % 128 == 0) else 0
    if lane_chunks:
        # lane-dense partial sums: pure VPU adds on aligned 128-lane slices,
        # no per-tile cross-lane (XLU) reduction.
        sp = f[:, 0:128]
        qp = sp * sp
        for k in range(1, lane_chunks):
            blk = f[:, k * 128:(k + 1) * 128]
            sp = sp + blk
            qp = qp + blk * blk
    else:
        sp = jnp.sum(f, axis=-1, keepdims=True)
        qp = jnp.sum(f * f, axis=-1, keepdims=True)
    s_acc[...] += sp
    q_acc[...] += qp

    @pl.when(t == pl.num_programs(1) - 1)
    def _():
        s = jnp.sum(s_acc[...], axis=-1, keepdims=True)    # single XLU reduce
        q = jnp.sum(q_acc[...], axis=-1, keepdims=True)
        scale, shift = _group_scale_shift(s, q, gb_ref, p_ref, pt_ref, denom)
        scale_ref[0] = scale
        shift_ref[0] = shift


def _apply_upsample_kernel(f_ref, zq_ref, idx_ref, scale_ref, shift_ref,
                           w_ref, bias_ref, o_ref, *, f_channels, hw_low):
    f = f_ref[0].astype(jnp.float32)
    _norm_conv_combine(f, zq_ref[0], idx_ref[...], scale_ref[0], shift_ref[0],
                       w_ref, bias_ref, o_ref, f_channels, hw_low)


def _apply_identity_kernel(f_ref, zq_ref, scale_ref, shift_ref,
                           w_ref, bias_ref, o_ref, *, f_channels):
    f = f_ref[0].astype(jnp.float32)
    _norm_conv_combine(f, zq_ref[0], None, scale_ref[0], shift_ref[0],
                       w_ref, bias_ref, o_ref, f_channels, 0)


# ---------------------------------------------------------------------------
# Single-pass fused kernels (whole image per grid step)
# ---------------------------------------------------------------------------
def _fused_common(f_ref, zq_ref, idx, gb_ref, p_ref, pt_ref, w_ref, bias_ref,
                  o_ref, denom, f_channels, hw_low):
    f = f_ref[0].astype(jnp.float32)                       # [Cf, HW]
    s = jnp.sum(f, axis=-1, keepdims=True)
    q = jnp.sum(f * f, axis=-1, keepdims=True)
    scale, shift = _group_scale_shift(s, q, gb_ref, p_ref, pt_ref, denom)
    _norm_conv_combine(f, zq_ref[0], idx, scale, shift, w_ref, bias_ref, o_ref,
                       f_channels, hw_low)


def _fused_upsample_kernel(f_ref, zq_ref, idx_ref, gb_ref, p_ref, pt_ref,
                           w_ref, bias_ref, o_ref, *, denom, f_channels, hw_low):
    _fused_common(f_ref, zq_ref, idx_ref[...], gb_ref, p_ref, pt_ref,
                  w_ref, bias_ref, o_ref, denom, f_channels, hw_low)


def _fused_identity_kernel(f_ref, zq_ref, gb_ref, p_ref, pt_ref,
                           w_ref, bias_ref, o_ref, *, denom, f_channels):
    _fused_common(f_ref, zq_ref, None, gb_ref, p_ref, pt_ref,
                  w_ref, bias_ref, o_ref, denom, f_channels, 0)


# ---------------------------------------------------------------------------
# Wrapper
# ---------------------------------------------------------------------------
def spatial_norm_pallas(f_nchw, zq_nchw, gamma, beta, wy, by, wb, bb,
                        *, force_two_pass=False):
    """f_nchw: [B, Cf, H, W], zq_nchw: [B, Cz, h, w] -> [B, Cf, H, W]."""
    B, Cf, H, W = f_nchw.shape
    Bz, Cz, h, w = zq_nchw.shape
    assert Bz == B and Cf % NUM_GROUPS == 0
    cpg = Cf // NUM_GROUPS
    HW = H * W
    hwz = h * w
    identity = (H == h) and (W == w)

    e_in = jnp.dtype(f_nchw.dtype).itemsize
    mxu_dtype = zq_nchw.dtype          # bf16 inputs -> native bf16 MXU operands
    denom = float(HW * cpg)

    f_l = f_nchw.reshape(B, Cf, HW)                          # free reshape
    if identity:
        zq_in = zq_nchw.reshape(B, Cz, HW)                   # free reshape
        up_idx = None
    else:
        zq_in = zq_nchw.reshape(B, Cz, hwz)                  # low-res, stays small
        # F.interpolate 'nearest': src = floor(dst * in / out), flattened.
        row_idx = (jnp.arange(H) * h) // H
        col_idx = (jnp.arange(W) * w) // W
        up_idx = (row_idx[:, None] * w + col_idx[None, :]
                  ).reshape(1, HW).astype(jnp.int32)

    # GroupNorm affine packed into one small operand: [2, Cf, 1]
    gb = jnp.stack([gamma.reshape(Cf, 1), beta.reshape(Cf, 1)], axis=0
                   ).astype(jnp.float32)
    # factored group membership P[c,g] / P^T[g,c]
    gid = jnp.arange(Cf) // cpg
    P = (gid[:, None] == jnp.arange(NUM_GROUPS)[None, :]).astype(jnp.float32)
    PT = P.T
    # fused 1x1 conv weights [2*Cf, Cz] and bias [2*Cf, 1]
    w_fused = jnp.concatenate([wy[:, :, 0, 0], wb[:, :, 0, 0]], axis=0
                              ).astype(mxu_dtype)
    bias_fused = jnp.concatenate([by, bb], axis=0).reshape(2 * Cf, 1
                                                           ).astype(jnp.float32)

    vmem_limit, budget = _vmem_budget()

    # resident (non-streamed) VMEM estimate
    resident = 2 * (2 * Cf * Cz * e_in) + 2 * (2 * Cf * 4)
    resident += 2 * (2 * Cf * NUM_GROUPS * 4) + 8 * Cf * 4
    if not identity:
        resident += 2 * (Cz * hwz * e_in)

    # ---- single-pass fused path: f read from HBM exactly once ---------------
    fused_bytes = resident + 2 * 2 * Cf * HW * e_in + 4 * Cf * HW * 4 \
        + 2 * Cf * HW * 4
    if identity:
        fused_bytes += 2 * Cz * HW * e_in
    else:
        fused_bytes += hwz * HW * e_in + Cz * HW * 4 + 2 * HW * 4

    if (not force_two_pass) and fused_bytes <= budget:
        if identity:
            kern = functools.partial(_fused_identity_kernel,
                                     denom=denom, f_channels=Cf)
            in_specs = [
                pl.BlockSpec((1, Cf, HW), lambda b: (b, 0, 0)),
                pl.BlockSpec((1, Cz, HW), lambda b: (b, 0, 0)),
                pl.BlockSpec((2, Cf, 1), lambda b: (0, 0, 0)),
                pl.BlockSpec((Cf, NUM_GROUPS), lambda b: (0, 0)),
                pl.BlockSpec((NUM_GROUPS, Cf), lambda b: (0, 0)),
                pl.BlockSpec((2 * Cf, Cz), lambda b: (0, 0)),
                pl.BlockSpec((2 * Cf, 1), lambda b: (0, 0)),
            ]
            args = (f_l, zq_in, gb, P, PT, w_fused, bias_fused)
        else:
            kern = functools.partial(_fused_upsample_kernel,
                                     denom=denom, f_channels=Cf, hw_low=hwz)
            in_specs = [
                pl.BlockSpec((1, Cf, HW), lambda b: (b, 0, 0)),
                pl.BlockSpec((1, Cz, hwz), lambda b: (b, 0, 0)),
                pl.BlockSpec((1, HW), lambda b: (0, 0)),
                pl.BlockSpec((2, Cf, 1), lambda b: (0, 0, 0)),
                pl.BlockSpec((Cf, NUM_GROUPS), lambda b: (0, 0)),
                pl.BlockSpec((NUM_GROUPS, Cf), lambda b: (0, 0)),
                pl.BlockSpec((2 * Cf, Cz), lambda b: (0, 0)),
                pl.BlockSpec((2 * Cf, 1), lambda b: (0, 0)),
            ]
            args = (f_l, zq_in, up_idx, gb, P, PT, w_fused, bias_fused)

        out = pl.pallas_call(
            kern,
            out_shape=jax.ShapeDtypeStruct((B, Cf, HW), f_nchw.dtype),
            grid_spec=pltpu.PrefetchScalarGridSpec(
                num_scalar_prefetch=0, grid=(B,),
                in_specs=in_specs,
                out_specs=pl.BlockSpec((1, Cf, HW), lambda b: (b, 0, 0))),
            compiler_params=pltpu.CompilerParams(
                dimension_semantics=("parallel",),
                vmem_limit_bytes=vmem_limit),
        )(*args)
        return out.reshape(B, Cf, H, W)

    # ---- two-pass streamed path ---------------------------------------------
    per_col = _per_col_bytes(Cf, Cz, hwz, e_in, identity)
    tile, ragged = _pick_hw_tile(HW, per_col, max(budget - resident, 1 << 20))
    n_t = pl.cdiv(HW, tile) if ragged else HW // tile
    acc_w = 128 if (tile % 128 == 0 and tile >= 128) else 1

    # pass 1: stats -> per-channel scale/shift
    stats = functools.partial(_stats_kernel, denom=denom, hw_total=HW,
                              tile=tile, ragged=ragged)
    scale, shift = pl.pallas_call(
        stats,
        out_shape=(jax.ShapeDtypeStruct((B, Cf, 1), jnp.float32),
                   jax.ShapeDtypeStruct((B, Cf, 1), jnp.float32)),
        grid_spec=pltpu.PrefetchScalarGridSpec(
            num_scalar_prefetch=0,
            grid=(B, n_t),
            in_specs=[
                pl.BlockSpec((1, Cf, tile), lambda b, t: (b, 0, t)),
                pl.BlockSpec((2, Cf, 1), lambda b, t: (0, 0, 0)),
                pl.BlockSpec((Cf, NUM_GROUPS), lambda b, t: (0, 0)),
                pl.BlockSpec((NUM_GROUPS, Cf), lambda b, t: (0, 0)),
            ],
            out_specs=(pl.BlockSpec((1, Cf, 1), lambda b, t: (b, 0, 0)),
                       pl.BlockSpec((1, Cf, 1), lambda b, t: (b, 0, 0))),
            scratch_shapes=[pltpu.VMEM((Cf, acc_w), jnp.float32),
                            pltpu.VMEM((Cf, acc_w), jnp.float32)],
        ),
        compiler_params=pltpu.CompilerParams(
            dimension_semantics=("parallel", "arbitrary"),
            vmem_limit_bytes=vmem_limit),
    )(f_l, gb, P, PT)

    # pass 2: streamed normalize + fused convs + in-kernel upsample + combine
    if identity:
        kern = functools.partial(_apply_identity_kernel, f_channels=Cf)
        in_specs = [
            pl.BlockSpec((1, Cf, tile), lambda b, t: (b, 0, t)),
            pl.BlockSpec((1, Cz, tile), lambda b, t: (b, 0, t)),
            pl.BlockSpec((1, Cf, 1), lambda b, t: (b, 0, 0)),
            pl.BlockSpec((1, Cf, 1), lambda b, t: (b, 0, 0)),
            pl.BlockSpec((2 * Cf, Cz), lambda b, t: (0, 0)),
            pl.BlockSpec((2 * Cf, 1), lambda b, t: (0, 0)),
        ]
        args = (f_l, zq_in, scale, shift, w_fused, bias_fused)
    else:
        kern = functools.partial(_apply_upsample_kernel, f_channels=Cf,
                                 hw_low=hwz)
        in_specs = [
            pl.BlockSpec((1, Cf, tile), lambda b, t: (b, 0, t)),
            pl.BlockSpec((1, Cz, hwz), lambda b, t: (b, 0, 0)),   # low-res zq,
            pl.BlockSpec((1, tile), lambda b, t: (0, t)),          # refetched
            pl.BlockSpec((1, Cf, 1), lambda b, t: (b, 0, 0)),      # per batch only
            pl.BlockSpec((1, Cf, 1), lambda b, t: (b, 0, 0)),
            pl.BlockSpec((2 * Cf, Cz), lambda b, t: (0, 0)),
            pl.BlockSpec((2 * Cf, 1), lambda b, t: (0, 0)),
        ]
        args = (f_l, zq_in, up_idx, scale, shift, w_fused, bias_fused)

    out = pl.pallas_call(
        kern,
        out_shape=jax.ShapeDtypeStruct((B, Cf, HW), f_nchw.dtype),
        grid_spec=pltpu.PrefetchScalarGridSpec(
            num_scalar_prefetch=0, grid=(B, n_t),
            in_specs=in_specs,
            out_specs=pl.BlockSpec((1, Cf, tile), lambda b, t: (b, 0, t))),
        compiler_params=pltpu.CompilerParams(
            dimension_semantics=("parallel", "parallel"),
            vmem_limit_bytes=vmem_limit),
    )(*args)
    return out.reshape(B, Cf, H, W)


# ---------------------------------------------------------------------------
# Pure-JAX reference (mirrors the PyTorch forward, NCHW)
# ---------------------------------------------------------------------------
def spatial_norm_ref(f, zq, gamma, beta, wy, by, wb, bb):
    B, Cf, H, W = f.shape
    _, Cz, h, w = zq.shape
    cpg = Cf // NUM_GROUPS
    row_idx = ((jnp.arange(H) * h) // H).astype(jnp.int32)
    col_idx = ((jnp.arange(W) * w) // W).astype(jnp.int32)
    zq_up = zq[:, :, row_idx, :][:, :, :, col_idx]
    fg = f.reshape(B, NUM_GROUPS, cpg * H * W)
    mean = fg.mean(axis=-1, keepdims=True)
    var = fg.var(axis=-1, keepdims=True)
    norm = ((fg - mean) / jnp.sqrt(var + EPS)).reshape(B, Cf, H, W)
    norm = norm * gamma.reshape(1, Cf, 1, 1) + beta.reshape(1, Cf, 1, 1)
    y = jnp.einsum('bchw,oc->bohw', zq_up, wy[:, :, 0, 0]) + by.reshape(1, Cf, 1, 1)
    b = jnp.einsum('bchw,oc->bohw', zq_up, wb[:, :, 0, 0]) + bb.reshape(1, Cf, 1, 1)
    return norm * y + b


if __name__ == "__main__":
    B, Cf, Cz = 2, 64, 32
    H, W = 16, 16
    h, w = 8, 8

    key = jax.random.PRNGKey(0)
    k = jax.random.split(key, 9)
    f = jax.random.normal(k[0], (B, Cf, H, W), jnp.float32)
    zq = jax.random.normal(k[1], (B, Cz, h, w), jnp.float32)
    gamma = 1.0 + 0.1 * jax.random.normal(k[2], (Cf,), jnp.float32)
    beta = 0.1 * jax.random.normal(k[3], (Cf,), jnp.float32)
    wy = 0.1 * jax.random.normal(k[4], (Cf, Cz, 1, 1), jnp.float32)
    by = 0.1 * jax.random.normal(k[5], (Cf,), jnp.float32)
    wb = 0.1 * jax.random.normal(k[6], (Cf, Cz, 1, 1), jnp.float32)
    bb = 0.1 * jax.random.normal(k[7], (Cf,), jnp.float32)

    ref = spatial_norm_ref(f, zq, gamma, beta, wy, by, wb, bb)

    # fused single-pass path + in-kernel nearest upsample
    out_a = jax.block_until_ready(
        spatial_norm_pallas(f, zq, gamma, beta, wy, by, wb, bb))
    assert out_a.shape == (B, Cf, H, W)
    assert jnp.allclose(out_a, ref, atol=1e-4, rtol=1e-4), "fused/upsample mismatch"

    # two-pass streamed path (forced), same in-kernel upsample
    out_b = jax.block_until_ready(
        spatial_norm_pallas(f, zq, gamma, beta, wy, by, wb, bb,
                            force_two_pass=True))
    assert jnp.allclose(out_b, ref, atol=1e-4, rtol=1e-4), "two-pass/upsample mismatch"

    # identity-resolution fast path (zq already at f's resolution)
    zq_same = jax.random.normal(k[8], (B, Cz, H, W), jnp.float32)
    ref_same = spatial_norm_ref(f, zq_same, gamma, beta, wy, by, wb, bb)
    out_c = jax.block_until_ready(
        spatial_norm_pallas(f, zq_same, gamma, beta, wy, by, wb, bb))
    assert jnp.allclose(out_c, ref_same, atol=1e-4, rtol=1e-4), "fused/identity mismatch"

    out_d = jax.block_until_ready(
        spatial_norm_pallas(f, zq_same, gamma, beta, wy, by, wb, bb,
                            force_two_pass=True))
    assert jnp.allclose(out_d, ref_same, atol=1e-4, rtol=1e-4), "two-pass/identity mismatch"

    print("KERNEL_OK")
</pallas_src>

<mosaic_0001>
module attributes {stable_mosaic.version = 11 : i64} {
  func.func @_fused_upsample_kernel(%arg0: i32, %arg1: memref<1x64x256xf32, #tpu.memory_space<vmem>>, %arg2: memref<1x32x64xf32, #tpu.memory_space<vmem>>, %arg3: memref<1x256xi32, #tpu.memory_space<vmem>>, %arg4: memref<2x64x1xf32, #tpu.memory_space<vmem>>, %arg5: memref<64x32xf32, #tpu.memory_space<vmem>>, %arg6: memref<32x64xf32, #tpu.memory_space<vmem>>, %arg7: memref<128x32xf32, #tpu.memory_space<vmem>>, %arg8: memref<128x1xf32, #tpu.memory_space<vmem>>, %arg9: memref<1x64x256xf32, #tpu.memory_space<vmem>>) attributes {dimension_semantics = [#tpu.dimension_semantics<parallel>], iteration_bounds = array<i64: 2>, scalar_prefetch = 0 : i64, scratch_operands = 0 : i64, tpu.core_type = #tpu.core_type<tc>, window_params = [{transform_indices = @transform_0, window_bounds = array<i64: 1, 64, 256>}, {transform_indices = @transform_1, window_bounds = array<i64: 1, 32, 64>}, {pipeline_mode = #tpu.pipeline_mode<synchronous>, transform_indices = @transform_2, window_bounds = array<i64: 1, 256>}, {pipeline_mode = #tpu.pipeline_mode<synchronous>, transform_indices = @transform_3, window_bounds = array<i64: 2, 64, 1>}, {pipeline_mode = #tpu.pipeline_mode<synchronous>, transform_indices = @transform_4, window_bounds = array<i64: 64, 32>}, {pipeline_mode = #tpu.pipeline_mode<synchronous>, transform_indices = @transform_5, window_bounds = array<i64: 32, 64>}, {pipeline_mode = #tpu.pipeline_mode<synchronous>, transform_indices = @transform_6, window_bounds = array<i64: 128, 32>}, {pipeline_mode = #tpu.pipeline_mode<synchronous>, transform_indices = @transform_7, window_bounds = array<i64: 128, 1>}, {transform_indices = @transform_8, window_bounds = array<i64: 1, 64, 256>}]} {
    %c0 = arith.constant 0 : index
    %c0_0 = arith.constant 0 : index
    %0 = vector.load %arg3[%c0, %c0_0] : memref<1x256xi32, #tpu.memory_space<vmem>>, vector<1x256xi32>
    %c0_1 = arith.constant 0 : index
    %c0_2 = arith.constant 0 : index
    %c0_3 = arith.constant 0 : index
    %1 = vector.load %arg1[%c0_1, %c0_2, %c0_3] : memref<1x64x256xf32, #tpu.memory_space<vmem>>, vector<1x64x256xf32>
    %2 = vector.shape_cast %1 : vector<1x64x256xf32> to vector<64x256xf32>
    %cst = arith.constant dense<0.000000e+00> : vector<64xf32>
    %3 = vector.multi_reduction <add>, %2, %cst [1] : vector<64x256xf32> to vector<64xf32>
    %4 = vector.shape_cast %3 : vector<64xf32> to vector<64x1xf32>
    %5 = arith.mulf %2, %2 : vector<64x256xf32>
    %cst_4 = arith.constant dense<0.000000e+00> : vector<64xf32>
    %6 = vector.multi_reduction <add>, %5, %cst_4 [1] : vector<64x256xf32> to vector<64xf32>
    %7 = vector.shape_cast %6 : vector<64xf32> to vector<64x1xf32>
    %c0_5 = arith.constant 0 : index
    %c0_6 = arith.constant 0 : index
    %8 = vector.load %arg6[%c0_5, %c0_6] : memref<32x64xf32, #tpu.memory_space<vmem>>, vector<32x64xf32>
    %cst_7 = arith.constant dense<0.000000e+00> : vector<32x1xf32>
    %9 = tpu.matmul %8, %4, %cst_7 {dimension_numbers = #tpu.dot_dimension_numbers<[1], [0], [0], [1], [0, 0, 1, 1], [], []>} : vector<32x64xf32>, vector<64x1xf32>, vector<32x1xf32> -> vector<32x1xf32>
    %c0_8 = arith.constant 0 : index
    %c0_9 = arith.constant 0 : index
    %10 = vector.load %arg6[%c0_8, %c0_9] : memref<32x64xf32, #tpu.memory_space<vmem>>, vector<32x64xf32>
    %cst_10 = arith.constant dense<0.000000e+00> : vector<32x1xf32>
    %11 = tpu.matmul %10, %7, %cst_10 {dimension_numbers = #tpu.dot_dimension_numbers<[1], [0], [0], [1], [0, 0, 1, 1], [], []>} : vector<32x64xf32>, vector<64x1xf32>, vector<32x1xf32> -> vector<32x1xf32>
    %c0_11 = arith.constant 0 : index
    %c0_12 = arith.constant 0 : index
    %12 = vector.load %arg5[%c0_11, %c0_12] : memref<64x32xf32, #tpu.memory_space<vmem>>, vector<64x32xf32>
    %cst_13 = arith.constant dense<0.000000e+00> : vector<64x1xf32>
    %13 = tpu.matmul %12, %9, %cst_13 {dimension_numbers = #tpu.dot_dimension_numbers<[1], [0], [0], [1], [0, 0, 1, 1], [], []>} : vector<64x32xf32>, vector<32x1xf32>, vector<64x1xf32> -> vector<64x1xf32>
    %cst_14 = arith.constant 5.120000e+02 : f32
    %14 = vector.broadcast %cst_14 : f32 to vector<64x1xf32>
    %15 = arith.divf %13, %14 : vector<64x1xf32>
    %c0_15 = arith.constant 0 : index
    %c0_16 = arith.constant 0 : index
    %16 = vector.load %arg5[%c0_15, %c0_16] : memref<64x32xf32, #tpu.memory_space<vmem>>, vector<64x32xf32>
    %cst_17 = arith.constant dense<0.000000e+00> : vector<64x1xf32>
    %17 = tpu.matmul %16, %11, %cst_17 {dimension_numbers = #tpu.dot_dimension_numbers<[1], [0], [0], [1], [0, 0, 1, 1], [], []>} : vector<64x32xf32>, vector<32x1xf32>, vector<64x1xf32> -> vector<64x1xf32>
    %cst_18 = arith.constant 5.120000e+02 : f32
    %18 = vector.broadcast %cst_18 : f32 to vector<64x1xf32>
    %19 = arith.divf %17, %18 : vector<64x1xf32>
    %20 = arith.mulf %15, %15 : vector<64x1xf32>
    %21 = arith.subf %19, %20 : vector<64x1xf32>
    %cst_19 = arith.constant 0.000000e+00 : f32
    %22 = vector.broadcast %cst_19 : f32 to vector<64x1xf32>
    %23 = arith.maximumf %21, %22 : vector<64x1xf32>
    %cst_20 = arith.constant 9.99999997E-7 : f32
    %24 = vector.broadcast %cst_20 : f32 to vector<64x1xf32>
    %25 = arith.addf %23, %24 : vector<64x1xf32>
    %26 = math.rsqrt %25 : vector<64x1xf32>
    %c0_21 = arith.constant 0 : index
    %c0_22 = arith.constant 0 : index
    %c0_23 = arith.constant 0 : index
    %27 = vector.load %arg4[%c0_21, %c0_22, %c0_23] : memref<2x64x1xf32, #tpu.memory_space<vmem>>, vector<1x64x1xf32>
    %28 = vector.shape_cast %27 : vector<1x64x1xf32> to vector<64x1xf32>
    %c1 = arith.constant 1 : index
    %c0_24 = arith.constant 0 : index
    %c0_25 = arith.constant 0 : index
    %29 = vector.load %arg4[%c1, %c0_24, %c0_25] : memref<2x64x1xf32, #tpu.memory_space<vmem>>, vector<1x64x1xf32>
    %30 = vector.shape_cast %29 : vector<1x64x1xf32> to vector<64x1xf32>
    %31 = arith.mulf %26, %28 : vector<64x1xf32>
    %32 = arith.mulf %15, %31 : vector<64x1xf32>
    %33 = arith.subf %30, %32 : vector<64x1xf32>
    %c0_26 = arith.constant 0 : index
    %c0_27 = arith.constant 0 : index
    %c0_28 = arith.constant 0 : index
    %34 = vector.load %arg2[%c0_26, %c0_27, %c0_28] : memref<1x32x64xf32, #tpu.memory_space<vmem>>, vector<1x32x64xf32>
    %35 = vector.shape_cast %34 : vector<1x32x64xf32> to vector<32x64xf32>
    %36 = tpu.iota {dimensions = array<i32: 0>} : vector<64x256xi32>
    %37 = vector.broadcast %0 : vector<1x256xi32> to vector<64x256xi32>
    %38 = arith.cmpi eq, %36, %37 : vector<64x256xi32>
    %39 = arith.extui %38 : vector<64x256xi1> to vector<64x256xi32>
    %40 = arith.sitofp %39 : vector<64x256xi32> to vector<64x256xf32>
    %cst_29 = arith.constant dense<0.000000e+00> : vector<32x256xf32>
    %41 = tpu.matmul %35, %40, %cst_29 {dimension_numbers = #tpu.dot_dimension_numbers<[1], [0], [0], [1], [0, 0, 1, 1], [], []>} : vector<32x64xf32>, vector<64x256xf32>, vector<32x256xf32> -> vector<32x256xf32>
    %c0_30 = arith.constant 0 : index
    %c0_31 = arith.constant 0 : index
    %42 = vector.load %arg7[%c0_30, %c0_31] : memref<128x32xf32, #tpu.memory_space<vmem>>, vector<128x32xf32>
    %cst_32 = arith.constant dense<0.000000e+00> : vector<128x256xf32>
    %43 = tpu.matmul %42, %41, %cst_32 {dimension_numbers = #tpu.dot_dimension_numbers<[1], [0], [0], [1], [0, 0, 1, 1], [], []>} : vector<128x32xf32>, vector<32x256xf32>, vector<128x256xf32> -> vector<128x256xf32>
    %c0_33 = arith.constant 0 : index
    %c0_34 = arith.constant 0 : index
    %44 = vector.load %arg8[%c0_33, %c0_34] : memref<128x1xf32, #tpu.memory_space<vmem>>, vector<128x1xf32>
    %45 = vector.broadcast %44 : vector<128x1xf32> to vector<128x256xf32>
    %46 = arith.addf %43, %45 : vector<128x256xf32>
    %47 = vector.extract_strided_slice %46 {offsets = [0, 0], sizes = [64, 256], strides = [1, 1]} : vector<128x256xf32> to vector<64x256xf32>
    %48 = vector.extract_strided_slice %46 {offsets = [64, 0], sizes = [64, 256], strides = [1, 1]} : vector<128x256xf32> to vector<64x256xf32>
    %49 = vector.broadcast %31 : vector<64x1xf32> to vector<64x256xf32>
    %50 = arith.mulf %2, %49 : vector<64x256xf32>
    %51 = vector.broadcast %33 : vector<64x1xf32> to vector<64x256xf32>
    %52 = arith.addf %50, %51 : vector<64x256xf32>
    %53 = arith.mulf %52, %47 : vector<64x256xf32>
    %54 = arith.addf %53, %48 : vector<64x256xf32>
    %c0_35 = arith.constant 0 : index
    %c0_36 = arith.constant 0 : index
    %c0_37 = arith.constant 0 : index
    %55 = vector.load %arg9[%c0_35, %c0_36, %c0_37] : memref<1x64x256xf32, #tpu.memory_space<vmem>>, vector<1x64x256xf32>
    %56 = vector.shape_cast %55 : vector<1x64x256xf32> to vector<64x256xf32>
    %57 = vector.shape_cast %54 : vector<64x256xf32> to vector<1x64x256xf32>
    tpu.vector_store %arg9[%c0_35, %c0_36, %c0_37], %57 {strides = array<i32>} : memref<1x64x256xf32, #tpu.memory_space<vmem>>, vector<1x64x256xf32>,
    return
  }
  func.func @transform_0(%arg0: i32) -> (i32, i32, i32) {
    %c0_i32 = arith.constant 0 : i32
    %c0_i32_0 = arith.constant 0 : i32
    %c0_i32_1 = arith.constant 0 : i32
    return %arg0, %c0_i32, %c0_i32_0 : i32, i32, i32
  }
  func.func @transform_1(%arg0: i32) -> (i32, i32, i32) {
    %c0_i32 = arith.constant 0 : i32
    %c0_i32_0 = arith.constant 0 : i32
    %c0_i32_1 = arith.constant 0 : i32
    return %arg0, %c0_i32, %c0_i32_0 : i32, i32, i32
  }
  func.func @transform_2(%arg0: i32) -> (i32, i32) {
    %c0_i32 = arith.constant 0 : i32
    %c0_i32_0 = arith.constant 0 : i32
    %c0_i32_1 = arith.constant 0 : i32
    return %c0_i32, %c0_i32_0 : i32, i32
  }
  func.func @transform_3(%arg0: i32) -> (i32, i32, i32) {
    %c0_i32 = arith.constant 0 : i32
    %c0_i32_0 = arith.constant 0 : i32
    %c0_i32_1 = arith.constant 0 : i32
    %c0_i32_2 = arith.constant 0 : i32
    return %c0_i32, %c0_i32_0, %c0_i32_1 : i32, i32, i32
  }
  func.func @transform_4(%arg0: i32) -> (i32, i32) {
    %c0_i32 = arith.constant 0 : i32
    %c0_i32_0 = arith.constant 0 : i32
    %c0_i32_1 = arith.constant 0 : i32
    return %c0_i32, %c0_i32_0 : i32, i32
  }
  func.func @transform_5(%arg0: i32) -> (i32, i32) {
    %c0_i32 = arith.constant 0 : i32
    %c0_i32_0 = arith.constant 0 : i32
    %c0_i32_1 = arith.constant 0 : i32
    return %c0_i32, %c0_i32_0 : i32, i32
  }
  func.func @transform_6(%arg0: i32) -> (i32, i32) {
    %c0_i32 = arith.constant 0 : i32
    %c0_i32_0 = arith.constant 0 : i32
    %c0_i32_1 = arith.constant 0 : i32
    return %c0_i32, %c0_i32_0 : i32, i32
  }
  func.func @transform_7(%arg0: i32) -> (i32, i32) {
    %c0_i32 = arith.constant 0 : i32
    %c0_i32_0 = arith.constant 0 : i32
    %c0_i32_1 = arith.constant 0 : i32
    return %c0_i32, %c0_i32_0 : i32, i32
  }
  func.func @transform_8(%arg0: i32) -> (i32, i32, i32) {
    %c0_i32 = arith.constant 0 : i32
    %c0_i32_0 = arith.constant 0 : i32
    %c0_i32_1 = arith.constant 0 : i32
    return %arg0, %c0_i32, %c0_i32_0 : i32, i32, i32
  }
}

</mosaic_0001>

<bundles_post_ra>
// kernel: tpu_custom_call.1
= control target key start
LH: loop header
LB: loop body
LE: loop exit
PB: predicated region body
PF: predicated region fallthrough
CT: control target
= control target key end

     0   :  { %s3379_s0 = inlined_call_operand.hbm [shape: f32[2,64,256], index: 0, kind: input, shape index: {}]   ;;  %s3380_s1 = inlined_call_operand.hbm [shape: f32[2,32,64], index: 1, kind: input, shape index: {}]   ;;  %s3381_s2 = inlined_call_operand.hbm [shape: s32[1,256], index: 2, kind: input, shape index: {}]   ;;  %s3382_s3 = inlined_call_operand.hbm [shape: f32[2,64,1], index: 3, kind: input, shape index: {}]   ;;  %s3383_s4 = inlined_call_operand.hbm [shape: f32[64,32], index: 4, kind: input, shape index: {}]   ;;  %s3384_s5 = inlined_call_operand.hbm [shape: f32[32,64], index: 5, kind: input, shape index: {}]   ;;  %s3385_s6 = inlined_call_operand.hbm [shape: f32[128,32], index: 6, kind: input, shape index: {}]   ;;  %s3386_s7 = inlined_call_operand.hbm [shape: f32[128,1], index: 7, kind: input, shape index: {}]   ;;  %s3387_s8 = inlined_call_operand.hbm [shape: f32[2,64,256], index: 8, kind: output, shape index: {}]  }
   0x1   :  { %3393 = sst [smem:[#allocation24_spill]] %s3379_s0 }
   0x2   :  { %3394 = sst [smem:[#allocation25_spill]] %s3381_s2 }
   0x3   :  { %3395 = sst [smem:[#allocation26_spill]] %s3382_s3 }
   0x4   :  { %3396 = sst [smem:[#allocation27_spill]] %s3383_s4 }
   0x5   :  { %3397 = sst [smem:[#allocation28_spill]] %s3384_s5 }
   0x6   :  { %3398 = sst [smem:[#allocation29_spill]] %s3385_s6 }
   0x7   :  { %13 = vsyncpa [#allocation3], 0 }
   0x8   :  { %15 = vsyncpa [#allocation3 + $0x1], 0 }
   0x9   :  { %16 = vsyncpa [#allocation6], 0 }
   0xa   :  { %18 = vsyncpa [#allocation6 + $0x1], 0 }
   0xb   :  { %19 = vsyncpa [#allocation9], 0 }
   0xc   :  { %20 = vsyncpa [#allocation12], 0 }
   0xd   :  { %21 = vsyncpa [#allocation15], 0 }
   0xe   :  { %22 = vsyncpa [#allocation4], 0 }
   0xf   :  { %24 = vsyncpa [#allocation4 + $0x1], 0  ;;  %s2723_s27 = smov 0   ;;  %s2725_s28 = smov 0  }
  0x10   :  { %s2727_s29 = smov 0   ;;  %s2729_s30 = smov 0  }
  0x11 LB: > { %s2660_s9 = smov [#allocation7]   ;;  %s2744_s11 = sadd.s32 4294967295, %s2658_s30   ;;  %s2658_s30 = sphi %s2729_s30, %s3432_s30   ;;  %s2654_s29 = sphi %s2727_s29, %s3431_s29   ;;  %s2650_s28 = sphi %s2725_s28, %s3430_s28   ;;  %s2646_s27 = sphi %s2723_s27, %s3429_s27  }
  0x12   : > { %s252_s10 = sshll.u32 %s2660_s9, 4  ;;  %p1877_p0 = scmp.ge.s32.totalorder %s2658_s30, 1  ;;  %s253_s10 = int_to_ptr.vmem [resolvable:$true] %s252_s10 }
  0x13   : > { %p3388_p1 = scmp.eq.s32.totalorder %s2744_s11, 0  ;;  %p239_p2 = scmp.lt.s32.totalorder %s2658_s30, 3 }
  0x14   : > { %s2661_s13 = smov [#allocation8]   ;;  %s2662_s16 = smov [#allocation11]  }
  0x15   : > { %p2749_p3 = pnand %p1877_p0, %p239_p2  ;;  %s262_s14 = sshll.u32 %s2661_s13, 4  ;;  %s2756_s14 = int_to_ptr.vmem [resolvable:$true] %s262_s14 }
  0x16   : > { %s288_s17 = sshll.u32 %s2662_s16, 4  ;;  %s3401_s2 = sld [smem:[#allocation25_spill]]  ;;  %s2764_s17 = int_to_ptr.vmem [resolvable:$true] %s288_s17 }
  0x17   : > { %s3399_s12 = scalar_select %p2749_p3, 1, 0 }
  0x18   : > { %p2223_p5 = pneg %p2749_p3 }
  0x1a   : > { %p2760_p6 = pnand %p2223_p5, %p3388_p1 }
  0x1c   : > { %s2344_s20 = scalar_lea.hbm %s3401_s2, 32  ;;  %p2774_p8 = pneg %p2760_p6 }
  0x1d   : > { %p2345_p7 = scmp.ne.s32.totalorder %s3401_s2, %s2344_s20  ;;  %p2351_p11 = scmp.lt.u32.totalorder %s2344_s20, %s3401_s2 }
  0x1f   : > { %p2347_p9 = pnand %p2774_p8, %p2345_p7 }
  0x21   : > { %p2348_p10 = pneg %p2347_p9 }
  0x23   : > { %p2353_p12 = pnand %p2351_p11, %p2348_p10 }
  0x25   : > { %2356 = shalt.err (!%p2353_p12)
}
  0x26   : > { %s2357_s26 = scalar_lea.vmem %s253_s10, 32  ;;  %p2365_p5 = scmp.lt.s32.totalorder %s253_s10, %s253_s10 }
  0x27   : > { %p2358_p13 = scmp.ne.s32.totalorder %s253_s10, %s2357_s26  ;;  %p2366_p4 = scmp.lt.s32.totalorder %s2357_s26, %s2357_s26 }
  0x29   : > { %p2360_p0 = pnand %p2358_p13, %p2774_p8  ;;  %p2367_p1 = por %p2366_p4, %p2365_p5 }
  0x2b   : > { %p2361_p2 = pneg %p2360_p0 }
  0x2d   : > { %p2368_p3 = pnand %p2367_p1, %p2361_p2 }
  0x2f   : > { %2371 = shalt.err (!%p2368_p3)
}
  0x30   : > { %2226 = dma.hbm_to_vmem [thread:$0]  (!%p2760_p6), %s3401_s2, 32, %s253_s10, [#allocation6]  }
  0x31   : > { %s3403_s3 = sld [smem:[#allocation26_spill]] }
  0x37   : > { %s2372_s19 = scalar_lea.hbm %s3403_s3, 2048 }
  0x38   : > { %p2373_p7 = scmp.ne.s32.totalorder %s3403_s3, %s2372_s19  ;;  %p2379_p1 = scmp.lt.u32.totalorder %s2372_s19, %s3403_s3 }
  0x3a   : > { %p2375_p9 = pnand %p2373_p7, %p2774_p8 }
  0x3c   : > { %p2376_p4 = pneg %p2375_p9 }
  0x3e   : > { %p2381_p3 = pnand %p2379_p1, %p2376_p4 }
  0x40   : > { %2384 = shalt.err (!%p2381_p3)
}
  0x41   : > { %s2385_s10 = scalar_lea.vmem %s2756_s14, 2048  ;;  %p2393_p13 = scmp.lt.s32.totalorder %s2756_s14, %s2756_s14 }
  0x42   : > { %p2386_p10 = scmp.ne.s32.totalorder %s2756_s14, %s2385_s10  ;;  %p2394_p0 = scmp.lt.s32.totalorder %s2385_s10, %s2385_s10 }
  0x44   : > { %p2388_p11 = pnand %p2386_p10, %p2774_p8  ;;  %p2395_p2 = por %p2394_p0, %p2393_p13 }
  0x46   : > { %p2389_p12 = pneg %p2388_p11 }
  0x48   : > { %p2396_p5 = pnand %p2395_p2, %p2389_p12 }
  0x4a   : > { %2399 = shalt.err (!%p2396_p5)
}
  0x4b   : > { %s3390_s25 = smov 128   ;;  %s3391_s26 = smov 8  }
  0x4c   : > { %2229 = dma.hbm_to_vmem [thread:$0]  (!%p2760_p6), %s3403_s3, 2048, %s2756_s14, [#allocation9], %s3390_s25, %s3390_s25, %s3391_s26  }
  0x4d   : > { %s3404_s5 = sld [smem:[#allocation28_spill]] }
  0x53   : > { %s2400_s19 = scalar_lea.hbm %s3404_s5, 512 }
  0x54   : > { %p2401_p7 = scmp.ne.s32.totalorder %s3404_s5, %s2400_s19  ;;  %p2407_p1 = scmp.lt.u32.totalorder %s2400_s19, %s3404_s5 }
  0x56   : > { %p2403_p9 = pnand %p2401_p7, %p2774_p8 }
  0x58   : > { %p2404_p4 = pneg %p2403_p9 }
  0x5a   : > { %p2409_p3 = pnand %p2407_p1, %p2404_p4 }
  0x5c   : > { %2412 = shalt.err (!%p2409_p3)
}
  0x5d   : > { %s2413_s14 = scalar_lea.vmem %s2764_s17, 512  ;;  %p2421_p13 = scmp.lt.s32.totalorder %s2764_s17, %s2764_s17 }
  0x5e   : > { %p2414_p10 = scmp.ne.s32.totalorder %s2764_s17, %s2413_s14  ;;  %p2422_p0 = scmp.lt.s32.totalorder %s2413_s14, %s2413_s14 }
  0x60   : > { %p2416_p11 = pnand %p2414_p10, %p2774_p8  ;;  %p2423_p2 = por %p2422_p0, %p2421_p13 }
  0x62   : > { %p2417_p12 = pneg %p2416_p11 }
  0x64   : > { %p2424_p5 = pnand %p2423_p2, %p2417_p12 }
  0x66   : > { %2427 = shalt.err (!%p2424_p5)
}
  0x67   : > { %2235 = dma.hbm_to_vmem [thread:$0]  (!%p2760_p6), %s3404_s5, 512, %s2764_s17, [#allocation12], %s3390_s25, %s3390_s25, %s3391_s26  }
  0x68   : > { %s2665_s13 = smov [#allocation10]   ;;  %s2666_s18 = smov [#allocation13]  }
  0x69   : > { %s275_s16 = sshll.u32 %s2665_s13, 4  ;;  %s301_s19 = sshll.u32 %s2666_s18, 4  ;;  %s276_s16 = int_to_ptr.vmem [resolvable:$true] %s275_s16  ;;  %s302_s19 = int_to_ptr.vmem [resolvable:$true] %s301_s19 }
  0x6a   : > { %s3405_s4 = sld [smem:[#allocation27_spill]] }
  0x70   : > { %s2428_s22 = scalar_lea.hbm %s3405_s4, 1024 }
  0x71   : > { %p2429_p7 = scmp.ne.s32.totalorder %s3405_s4, %s2428_s22  ;;  %p2435_p1 = scmp.lt.u32.totalorder %s2428_s22, %s3405_s4 }
  0x73   : > { %p2431_p9 = pnand %p2429_p7, %p2774_p8 }
  0x75   : > { %p2432_p4 = pneg %p2431_p9 }
  0x77   : > { %p2437_p3 = pnand %p2435_p1, %p2432_p4 }
  0x79   : > { %2440 = shalt.err (!%p2437_p3)
}
  0x7a   : > { %s2441_s17 = scalar_lea.vmem %s276_s16, 1024  ;;  %p2449_p13 = scmp.lt.s32.totalorder %s276_s16, %s276_s16 }
  0x7b   : > { %p2442_p10 = scmp.ne.s32.totalorder %s276_s16, %s2441_s17  ;;  %p2450_p0 = scmp.lt.s32.totalorder %s2441_s17, %s2441_s17 }
  0x7d   : > { %p2444_p11 = pnand %p2442_p10, %p2774_p8  ;;  %p2451_p2 = por %p2450_p0, %p2449_p13 }
  0x7f   : > { %p2445_p12 = pneg %p2444_p11 }
  0x81   : > { %p2452_p5 = pnand %p2451_p2, %p2445_p12 }
  0x83   : > { %2455 = shalt.err (!%p2452_p5)
}
  0x84   : > { %2232 = dma.hbm_to_vmem [thread:$0]  (!%p2760_p6), %s3405_s4, 1024, %s276_s16, [#allocation9], %s3390_s25, %s3390_s25, %s3391_s26  }
  0x85   : > { %s3406_s6 = sld [smem:[#allocation29_spill]] }
  0x8b   : > { %s2456_s20 = scalar_lea.hbm %s3406_s6, 2048 }
  0x8c   : > { %p2457_p7 = scmp.ne.s32.totalorder %s3406_s6, %s2456_s20  ;;  %p2463_p1 = scmp.lt.u32.totalorder %s2456_s20, %s3406_s6 }
  0x8e   : > { %p2459_p9 = pnand %p2457_p7, %p2774_p8 }
  0x90   : > { %p2460_p4 = pneg %p2459_p9 }
  0x92   : > { %p2465_p3 = pnand %p2463_p1, %p2460_p4 }
  0x94   : > { %2468 = shalt.err (!%p2465_p3)
}
  0x95   : > { %s2469_s10 = scalar_lea.vmem %s302_s19, 2048  ;;  %p2477_p13 = scmp.lt.s32.totalorder %s302_s19, %s302_s19 }
  0x96   : > { %p2470_p10 = scmp.ne.s32.totalorder %s302_s19, %s2469_s10  ;;  %p2478_p0 = scmp.lt.s32.totalorder %s2469_s10, %s2469_s10 }
  0x98   : > { %p2472_p11 = pnand %p2470_p10, %p2774_p8  ;;  %p2479_p2 = por %p2478_p0, %p2477_p13 }
  0x9a   : > { %p2473_p12 = pneg %p2472_p11 }
  0x9c   : > { %p2480_p5 = pnand %p2479_p2, %p2473_p12 }
  0x9e   : > { %2483 = shalt.err (!%p2480_p5)
}
  0x9f   : > { %2238 = dma.hbm_to_vmem [thread:$0]  (!%p2760_p6), %s3406_s6, 2048, %s302_s19, [#allocation12], %s3390_s25, %s3390_s25, %s3391_s26  }
  0xa0   : > { %s2667_s2 = smov [#allocation14]   ;;  %s2484_s20 = scalar_lea.hbm %s3386_s7, 2048 }
  0xa1   : > { %s314_s9 = sshll.u32 %s2667_s2, 4  ;;  %p2485_p7 = scmp.ne.s32.totalorder %s3386_s7, %s2484_s20  ;;  %s315_s9 = int_to_ptr.vmem [resolvable:$true] %s314_s9 }
  0xa2   : > { %p2491_p1 = scmp.lt.u32.totalorder %s2484_s20, %s3386_s7 }
  0xa3   : > { %p2487_p9 = pnand %p2485_p7, %p2774_p8 }
  0xa5   : > { %p2488_p4 = pneg %p2487_p9 }
  0xa7   : > { %p2493_p3 = pnand %p2491_p1, %p2488_p4 }
  0xa9   : > { %2496 = shalt.err (!%p2493_p3)
}
  0xaa   : > { %s2497_s19 = scalar_lea.vmem %s315_s9, 2048  ;;  %p2505_p13 = scmp.lt.s32.totalorder %s315_s9, %s315_s9 }
  0xab   : > { %p2498_p10 = scmp.ne.s32.totalorder %s315_s9, %s2497_s19  ;;  %p2506_p0 = scmp.lt.s32.totalorder %s2497_s19, %s2497_s19 }
  0xad   : > { %p2500_p11 = pnand %p2498_p10, %p2774_p8  ;;  %p2507_p2 = por %p2506_p0, %p2505_p13 }
  0xaf   : > { %p2501_p12 = pneg %p2500_p11 }
  0xb1   : > { %p2508_p5 = pnand %p2507_p2, %p2501_p12 }
  0xb3   : > { %2511 = shalt.err (!%p2508_p5)
}
  0xb4   : > { %2241 = dma.hbm_to_vmem [thread:$0]  (!%p2760_p6), %s3386_s7, 2048, %s315_s9, [#allocation15], %s3390_s25, %s3390_s25, %s3391_s26  }
  0xb5   : > { %s1876_s15 = sadd.s32 4294967294, %s2658_s30   ;;  %s2907_s23 = sadd.s32 1, %s2658_s30  }
  0xb6   : > { %s34_s17 = ssub.s32 %s2658_s30, %s2907_s23  ;;  %s37_s2 = sadd.s32 1, %s2654_s29 }
  0xb7   : > { %p35_p8 = scmp.eq.s32.totalorder %s34_s17, 0  ;;  %p44_p7 = scmp.ne.s32.totalorder %s2654_s29, %s2650_s28 }
  0xb8   : > { %p45_p9 = scmp.eq.s32.totalorder %s2658_s30, 0  ;;  %p50_p4 = scmp.ne.s32.totalorder %s2650_s28, %s2646_s27 }
  0xb9   : > { %s2918_s13 = scalar_select %p35_p8, %s2654_s29, %s37_s2  }
  0xba   : > { %p2920_p1 = por %p45_p9, %p44_p7  ;;  %p3408_p3 = scmp.eq.s32.totalorder %s2744_s11, 0 }
  0xbb   : > { %p226_p10 = scmp.eq.s32.totalorder %s2744_s11, 1  ;;  %p232_p11 = scmp.eq.s32.totalorder %s1876_s15, 1 }
  0xbc   : > { %p2926_p6 = por %p3408_p3, %p50_p4  ;;  %p2259_p12 = scmp.lt.s32.totalorder %s2658_s30, 2 }
  0xbd   : > { %s2933_s20 = sand.u32 1, %s2654_s29   ;;  %p2935_p13 = por %p226_p10, %p44_p7 }
  0xbe   : > { %p2939_p0 = por %p232_p11, %p50_p4  ;;  %s1885_s24 = sshll.u32 %s2933_s20, 7 }
  0xbf   : > { %s3410_s21 = scalar_select %p2935_p13, 1, 0 }
  0xc0   : > { %s3411_s22 = scalar_select %p2939_p0, 1, 0 }
  0xc1   : > { %s1982_s14 = sshll.u32 %s2658_s30, 11  ;;  %s3412_s0 = sld [smem:[#allocation24_spill]] }
  0xc2   : > { %s332_s15 = scalar_lea.vmem [#allocation2], %s1885_s24  ;;  %p2954_p2 = pnand %p2259_p12, %p2920_p1 }
  0xc3   : > { %s339_s17 = sshll.u32 %s332_s15, 4  ;;  %s329_s26 = scalar_lea.sflag [#allocation3], %s2933_s20  ;;  %s2950_s17 = int_to_ptr.vmem [resolvable:$true] %s339_s17 }
  0xc4   : > { %p2514_p8 = pneg %p2954_p2 }
  0xc7   : > { %s2948_s16 = scalar_lea.hbm %s3412_s0, %s1982_s14  ;;  %s2517_s18 = scalar_lea.hbm %s3412_s0, 4096 }
  0xc8   : > { %s2512_s19 = scalar_lea.hbm %s2948_s16, 2048  ;;  %p2518_p4 = scmp.lt.u32.totalorder %s2948_s16, %s3412_s0 }
  0xc9   : > { %p2513_p5 = scmp.ne.s32.totalorder %s2948_s16, %s2512_s19  ;;  %p2519_p1 = scmp.lt.u32.totalorder %s2517_s18, %s2512_s19 }
  0xca   : > { %p2521_p10 = scmp.lt.u32.totalorder %s2512_s19, %s2948_s16 }
  0xcb   : > { %p2515_p7 = pnand %p2514_p8, %p2513_p5  ;;  %p2520_p3 = por %p2519_p1, %p2518_p4 }
  0xcd   : > { %p2516_p9 = pneg %p2515_p7  ;;  %p2522_p11 = por %p2521_p10, %p2520_p3 }
  0xcf   : > { %p2523_p12 = pnand %p2522_p11, %p2516_p9 }
  0xd1   : > { %2526 = shalt.err (!%p2523_p12)
}
  0xd2   : > { %s2527_s25 = scalar_lea.vmem %s2950_s17, 2048  ;;  %s2668_s24 = smov [#allocation2]  }
  0xd3   : > { %p2528_p5 = scmp.ne.s32.totalorder %s2950_s17, %s2527_s25  ;;  %s2532_s14 = sshll.u32 %s2668_s24, 4  ;;  %s2533_s14 = int_to_ptr.vmem [resolvable:$false] %s2532_s14 }
  0xd4   : > { %s2534_s10 = scalar_lea.vmem %s2533_s14, 4096  ;;  %p2535_p13 = scmp.lt.s32.totalorder %s2950_s17, %s2533_s14 }
  0xd5   : > { %p2530_p7 = pnand %p2528_p5, %p2514_p8  ;;  %p2536_p4 = scmp.lt.s32.totalorder %s2534_s10, %s2527_s25 }
  0xd7   : > { %p2531_p0 = pneg %p2530_p7  ;;  %p2537_p1 = por %p2536_p4, %p2535_p13 }
  0xd9   : > { %p2538_p3 = pnand %p2537_p1, %p2531_p0 }
  0xdb   : > { %2541 = shalt.err (!%p2538_p3)
}
  0xdc   : > { %s2669_s19 = smov 256   ;;  %s2670_s18 = smov 16  }
  0xdd   : > { %2245 = dma.hbm_to_vmem [thread:$0]  (!%p2954_p2), %s2948_s16, 2048, %s2950_s17, %s329_s26, %s2669_s19, %s2669_s19, %s2670_s18  }
  0xde   : > { %s1888_s15 = sshll.u32 %s2933_s20, 5  ;;  %s1983_s24 = sshll.u32 %s2658_s30, 9 }
  0xdf   : > { %s2992_s10 = scalar_lea.hbm %s3380_s1, %s1983_s24  ;;  %s353_s0 = scalar_lea.vmem [#allocation5], %s1888_s15 }
  0xe0   : > { %s360_s3 = sshll.u32 %s353_s0, 4  ;;  %s3414_s4 = sand.u32 1, %s2658_s30   ;;  %s2994_s3 = int_to_ptr.vmem [resolvable:$true] %s360_s3 }
  0xe1   : > { %s2998_s5 = scalar_lea.sflag [#allocation6], %s3414_s4  ;;  %s2542_s6 = scalar_lea.hbm %s2992_s10, 512 }
  0xe2   : > { %p2543_p13 = scmp.ne.s32.totalorder %s2992_s10, %s2542_s6  ;;  %s2547_s16 = scalar_lea.hbm %s3380_s1, 1024 }
  0xe3   : > { %p2548_p10 = scmp.lt.u32.totalorder %s2992_s10, %s3380_s1  ;;  %p2549_p11 = scmp.lt.u32.totalorder %s2547_s16, %s2542_s6 }
  0xe4   : > { %p2545_p0 = pnand %p2543_p13, %p2514_p8  ;;  %p2551_p5 = scmp.lt.u32.totalorder %s2542_s6, %s2992_s10 }
  0xe5   : > { %p2550_p12 = por %p2549_p11, %p2548_p10 }
  0xe6   : > { %p2546_p9 = pneg %p2545_p0 }
  0xe7   : > { %p2552_p7 = por %p2551_p5, %p2550_p12 }
  0xe9   : > { %p2553_p4 = pnand %p2552_p7, %p2546_p9 }
  0xeb   : > { %2556 = shalt.err (!%p2553_p4)
}
  0xec   : > { %s2557_s0 = scalar_lea.vmem %s2994_s3, 512  ;;  %s2671_s4 = smov [#allocation5]  }
  0xed   : > { %p2558_p1 = scmp.ne.s32.totalorder %s2994_s3, %s2557_s0  ;;  %s2562_s18 = sshll.u32 %s2671_s4, 4  ;;  %s2563_s18 = int_to_ptr.vmem [resolvable:$false] %s2562_s18 }
  0xee   : > { %s2564_s15 = scalar_lea.vmem %s2563_s18, 1024  ;;  %p2565_p0 = scmp.lt.s32.totalorder %s2994_s3, %s2563_s18 }
  0xef   : > { %p2560_p3 = pnand %p2558_p1, %p2514_p8  ;;  %p2566_p10 = scmp.lt.s32.totalorder %s2564_s15, %s2557_s0 }
  0xf1   : > { %p2561_p13 = pneg %p2560_p3  ;;  %p2567_p11 = por %p2566_p10, %p2565_p0 }
  0xf3   : > { %p2568_p12 = pnand %p2567_p11, %p2561_p13 }
  0xf5   : > { %2571 = shalt.err (!%p2568_p12)
}
  0xf6   : > { %s3415_s6 = smov 8   ;;  %s3416_s24 = smov 128  }
  0xf7   : > { %2248 = dma.hbm_to_vmem [thread:$0]  (!%p2954_p2), %s2992_s10, 512, %s2994_s3, %s2998_s5, %s3416_s24, %s3416_s24, %s3415_s6  }
  0xf8   : > { %p3417_p8 = scmp.ne.s32.totalorder %s3399_s12, 0 }
  0xf9   : > { %s3030_s14 = sand.u32 (!%p3417_p8), 1, %s2650_s28  }
  0xfa   : > { %372 = sbr.rel (%p3417_p8) target bundleno = 1180 (0x49c), region = 52  ;;  %s1892_s25 = sshll.u32 (!%p3417_p8), %s3030_s14, 7 }
  0xfb   : > { %s375_s26 = scalar_lea.sflag (!%p3417_p8), [#allocation3], %s3030_s14  ;;  %s3036_s2 = scalar_lea.vmem (!%p3417_p8), [#allocation2], %s1892_s25 }
 0x101   : > { %2617 = dma.done.wait (%p2926_p6), %s375_s26, 2048  }
 0x102   : > { %2619 = vsyncadd (%p2926_p6), %s375_s26, 4294965248  ;;  %s383_s3 = sand.u32 1, %s2744_s11   ;;  %s1893_s5 = sshll.u32 %s3030_s14, 5 }
 0x103   : > { %s384_s12 = scalar_lea.sflag [#allocation6], %s383_s3  ;;  %s3044_s10 = scalar_lea.vmem [#allocation5], %s1893_s5 }
 0x104   : > { %2621 = dma.done.wait (%p2926_p6), %s384_s12, 512  }
 0x105   : > { %2623 = vsyncadd (%p2926_p6), %s384_s12, 4294966784  ;;  %p3418_p2 = scmp.eq.s32.totalorder %s2744_s11, 0 }
 0x107   : > { %2625 = dma.done.wait (%p3418_p2), [#allocation6], 32   ;;  %p3419_p9 = pmov %p3418_p2 }
 0x108   : > { %p3420_p5 = pmov %p3418_p2 }
 0x109   : > { %2627 = vsyncadd (%p3419_p9), [#allocation6], 4294967264 }
 0x10a   : > { %2629 = dma.done.wait (%p3420_p5), [#allocation9], 3072   ;;  %p3421_p7 = pmov %p3418_p2 }
 0x10b   : > { %p3422_p4 = pmov %p3418_p2 }
 0x10c   : > { %2631 = vsyncadd (%p3421_p7), [#allocation9], 4294964224 }
 0x10d   : > { %2633 = dma.done.wait (%p3422_p4), [#allocation12], 2560   ;;  %p3423_p1 = pmov %p3418_p2 }
 0x10f   : > { %2635 = vsyncadd (%p3423_p1), [#allocation12], 4294964736  ;;  %p3424_p6 = pmov %p3423_p1 }
 0x110   : > { %p3425_p3 = pmov %p3423_p1 }
 0x111   : > { %2637 = dma.done.wait (%p3424_p6), [#allocation15], 2048  }
 0x112   : > { %2639 = vsyncadd (%p3425_p3), [#allocation15], 4294965248  ;;  %v454_v0 = vld [vmem:[%s3036_s2 + $0x20] sm:$0xff]  ;;  %v455_v1 = vld [vmem:[%s3036_s2 + $0x28] sm:$0xff]  ;;  %vm534_vm0 = vcmask 523264   ;;  %vm725_vm1 = vcmask 261120  }
 0x113   : > { %v3069_v2 = vld [vmem:[%s3036_s2] sm:$0xff]  ;;  %v472_v3 = vadd.f32 %v455_v1, %v454_v0  ;;  %v3072_v4 = vld [vmem:[%s3036_s2 + $0x8] sm:$0xff]  ;;  %v456_v5 = vld [vmem:[%s3036_s2 + $0x30] sm:$0xff]  ;;  %v494_v32 = vmul.f32 %v454_v0, %v454_v0  ;;  %v495_v33 = vmul.f32 %v455_v1, %v455_v1  ;;  %s3264_s9 = scalar_lea.vmem [#allocation16], %s1892_s25  ;;  %s1984_s20 = sshll.u32 %s2744_s11, 11 }
 0x114   : > { %v457_v6 = vld [vmem:[%s3036_s2 + $0x38] sm:$0xff]  ;;  %v466_v7 = vadd.f32 %v3072_v4, %v3069_v2  ;;  %v3079_v8 = vld [vmem:[%s3036_s2 + $0x10] sm:$0xff]  ;;  %v458_v14 = vld [vmem:[%s3036_s2 + $0x40] sm:$0xff]  ;;  %v490_v26 = vmul.f32 %v3069_v2, %v3069_v2  ;;  %v491_v27 = vmul.f32 %v3072_v4, %v3072_v4  ;;  %v496_v29 = vmul.f32 %v456_v5, %v456_v5  ;;  %s1723_s16 = sshll.u32 %s3264_s9, 4  ;;  %s3331_s0 = scalar_lea.hbm %s3387_s8, %s1984_s20  ;;  %s3333_s16 = int_to_ptr.vmem [resolvable:$true] %s1723_s16 }
 0x115   : > { %v3082_v9 = vld [vmem:[%s3036_s2 + $0x18] sm:$0xff]  ;;  %473 = vadd.xlane.f32.xlu1 %v472_v3  ;;  %v475_v10 = vadd.f32 %v457_v6, %v456_v5  ;;  %v460_v12 = vld [vmem:[%s3036_s2 + $0x50] sm:$0xff]  ;;  %v459_v15 = vld [vmem:[%s3036_s2 + $0x48] sm:$0xff]  ;;  %v492_v23 = vmul.f32 %v3079_v8, %v3079_v8  ;;  %v497_v30 = vmul.f32 %v457_v6, %v457_v6  ;;  %v512_v37 = vadd.f32 %v495_v33, %v494_v32  ;;  %s1710_s11 = scalar_lea.sflag [#allocation4], %s3030_s14  ;;  %s2572_s4 = scalar_lea.vmem %s3333_s16, 2048 }
 0x116   : > { %467 = vadd.xlane.f32.xlu0 %v466_v7  ;;  %v469_v11 = vadd.f32 %v3082_v9, %v3079_v8  ;;  %v461_v13 = vld [vmem:[%s3036_s2 + $0x58] sm:$0xff]  ;;  %v478_v17 = vadd.f32 %v459_v15, %v458_v14  ;;  %v464_v18 = vld [vmem:[%s3036_s2 + $0x70] sm:$0xff]  ;;  %v462_v20 = vld [vmem:[%s3036_s2 + $0x60] sm:$0xff]  ;;  %v493_v24 = vmul.f32 %v3082_v9, %v3082_v9  ;;  %v506_v31 = vadd.f32 %v491_v27, %v490_v26  ;;  %p2573_p13 = scmp.ne.s32.totalorder %s3333_s16, %s2572_s4  ;;  %p3426_p0 = scmp.ne.s32.totalorder %s3410_s21, 0 }
 0x117   : > { %v481_v16 = vadd.f32 %v461_v13, %v460_v12  ;;  %v465_v19 = vld [vmem:[%s3036_s2 + $0x78] sm:$0xff]  ;;  %v463_v21 = vld [vmem:[%s3036_s2 + $0x68] sm:$0xff]  ;;  %v515_v34 = vadd.f32 %v497_v30, %v496_v29  ;;  %v500_v35 = vmul.f32 %v460_v12, %v460_v12  ;;  %v501_v36 = vmul.f32 %v461_v13, %v461_v13  ;;  %s2675_s18 = smov [#allocation16]  }
 0x118   : > { %v487_v22 = vadd.f32 %v465_v19, %v464_v18  ;;  %v484_v25 = vadd.f32 %v463_v21, %v462_v20  ;;  %v509_v28 = vadd.f32 %v493_v24, %v492_v23  ;;  %v498_v38 = vmul.f32 %v458_v14, %v458_v14  ;;  %v530_v48 = vld [vmem:[#allocation11] sm:$0xff]  ;;  %v531_v3 = vld [vmem:[#allocation11 + $0x8] sm:$0xff]  ;;  %v532_v6 = vld [vmem:[#allocation11 + $0x10] sm:$0xff]  ;;  %p2574_p10 = pnand %p2573_p13, %p3426_p0  ;;  %s2576_s15 = sshll.u32 %s2675_s18, 4  ;;  %s2577_s15 = int_to_ptr.vmem [resolvable:$false] %s2576_s15 }
 0x119   : > { %476 = vadd.xlane.f32.xlu1 %v475_v10  ;;  %v499_v39 = vmul.f32 %v459_v15, %v459_v15  ;;  %v521_v40 = vadd.f32 %v501_v36, %v500_v35  ;;  %v504_v41 = vmul.f32 %v464_v18, %v464_v18  ;;  %v505_v42 = vmul.f32 %v465_v19, %v465_v19  ;;  %v1246_v19 = vld [vmem:[#allocation14 + $0x10] sm:$0xff]  ;;  %v449_v23 = vld [vmem:[#allocation7] sm:$0x3]  ;;  %s2578_s6 = scalar_lea.vmem %s2577_s15, 4096  ;;  %p2579_p12 = scmp.lt.s32.totalorder %s3333_s16, %s2577_s15 }
 0x11a   : > { %470 = vadd.xlane.f32.xlu0 %v469_v11  ;;  %v502_v44 = vmul.f32 %v462_v20, %v462_v20  ;;  %v503_v45 = vmul.f32 %v463_v21, %v463_v21  ;;  %2049 = vmatprep.mubr.msk.f32.mxu0 %vm534_vm0, %v530_v48  ;;  %v533_v11 = vld [vmem:[#allocation11 + $0x18] sm:$0xff]  ;;  %v2672_v18 = vmov 0   ;;  %v1062_v20 = vlaneseq  ;;  %p2575_p11 = pneg %p2574_p10  ;;  %p2580_p8 = scmp.lt.s32.totalorder %s2578_s6, %s2572_s4 }
 0x11b   : > { %v518_v43 = vadd.f32 %v499_v39, %v498_v38  ;;  %v527_v46 = vadd.f32 %v505_v42, %v504_v41  ;;  %2071 = vmatprep.mubr.msk.f32.mxu1 %vm534_vm0, %v530_v48  ;;  %2315 = vset.pattern.permute.xlu1 %v2672_v18  ;;  %v718_v38 = vld [vmem:[#allocation10 + $0x8] sm:$0xff]  ;;  %v2673_v39 = vmov 1.0|1.0  }
 0x11c   : > { %v524_v47 = vadd.f32 %v503_v45, %v502_v44  ;;  %2314 = vset.pattern.permute.xlu0 %v2672_v18  ;;  %v1063_v21 = vshrl.u32 %v1062_v20, 7  ;;  %v720_v45 = vld [vmem:[#allocation10 + $0x18] sm:$0xff]  ;;  %p2581_p2 = por %p2580_p8, %p2579_p12 }
 0x11d   : > { %482 = vadd.xlane.f32.xlu1 %v481_v16  ;;  %v717_v16 = vld [vmem:[#allocation10] sm:$0xff] }
 0x11e   : > { %479 = vadd.xlane.f32.xlu0 %v478_v17  ;;  %v1245_v17 = vld [vmem:[#allocation14 + $0x8] sm:$0xff]  ;;  %v1073_v24 = vsub.s32 0, %v1063_v21  ;;  %v1064_v26 = vadd.s32 8, %v1063_v21  ;;  %v1065_v32 = vadd.s32 16, %v1063_v21  ;;  %v1066_v33 = vadd.s32 24, %v1063_v21  ;;  %p2582_p9 = pnand %p2581_p2, %p2575_p11 }
 0x11f   : > { %v1067_v36 = vadd.s32 32, %v1063_v21  ;;  %v1069_v42 = vadd.s32 48, %v1063_v21 }
 0x120   : > { %v3112_v30 = vrot.slane %v449_v23, %v1073_v24 }
 0x121   : > { %488 = vadd.xlane.f32.xlu1 %v487_v22  ;;  %v1077_v22 = vsub.s32 1, %v1063_v21 }
 0x122   : > { %485 = vadd.xlane.f32.xlu0 %v484_v25  ;;  %vm1079_vm5 = vcmp.eq.s32.totalorder %v1063_v21, %v3112_v30  ;;  %vm1081_vm6 = vcmp.eq.s32.totalorder %v1064_v26, %v3112_v30  ;;  %vm1083_vm11 = vcmp.eq.s32.totalorder %v1065_v32, %v3112_v30  ;;  %vm1085_vm12 = vcmp.eq.s32.totalorder %v1066_v33, %v3112_v30 }
 0x123   : > { %v1078_v27 = vrot.slane %v449_v23, %v1077_v22  ;;  %vm2167_vm9 = vmpackc.low %vm1081_vm6, %vm1079_vm5 }
 0x124   : > { %vm2171_vm15 = vmpackc.low %vm1085_vm12, %vm1083_vm11 }
 0x125   : > { %510 = vadd.xlane.f32.xlu1 %v509_v28  ;;  %vm1080_vm2 = vcmp.eq.s32.totalorder %v1063_v21, %v1078_v27  ;;  %vm1082_vm3 = vcmp.eq.s32.totalorder %v1064_v26, %v1078_v27  ;;  %vm1084_vm7 = vcmp.eq.s32.totalorder %v1065_v32, %v1078_v27  ;;  %vm1086_vm8 = vcmp.eq.s32.totalorder %v1066_v33, %v1078_v27 }
 0x126   : > { %507 = vadd.xlane.f32.xlu0 %v506_v31  ;;  %vm2165_vm4 = vmpackc.low %vm1082_vm3, %vm1080_vm2  ;;  %vm1088_vm13 = vcmp.eq.s32.totalorder %v1067_v36, %v1078_v27  ;;  %vm1087_vm3 = vcmp.eq.s32.totalorder %v1067_v36, %v3112_v30  ;;  %vm1092_vm5 = vcmp.eq.s32.totalorder %v1069_v42, %v1078_v27 }
 0x127   : > { %vm2169_vm10 = vmpackc.low %vm1086_vm8, %vm1084_vm7 }
 0x129   : > { %516 = vadd.xlane.f32.xlu1 %v515_v34 }
 0x12a   : > { %513 = vadd.xlane.f32.xlu0 %v512_v37  ;;  %v1068_v37 = vadd.s32 40, %v1063_v21 }
 0x12c   : > { %vm1090_vm14 = vcmp.eq.s32.totalorder %v1068_v37, %v1078_v27 }
 0x12d   : > { %522 = vadd.xlane.f32.xlu1 %v521_v40  ;;  %v719_v40 = vld [vmem:[#allocation10 + $0x10] sm:$0xff]  ;;  %vm2173_vm2 = vmpackc.low %vm1090_vm14, %vm1088_vm13 }
 0x12e   : > { %519 = vadd.xlane.f32.xlu0 %v518_v43  ;;  %v1070_v43 = vadd.s32 56, %v1063_v21 }
 0x130   : > { %vm1094_vm6 = vcmp.eq.s32.totalorder %v1070_v43, %v1078_v27 }
 0x131   : > { %528 = vadd.xlane.f32.xlu1 %v527_v46  ;;  %vm2177_vm8 = vmpackc.low %vm1094_vm6, %vm1092_vm5 }
 0x132   : > { %525 = vadd.xlane.f32.xlu0 %v524_v47  ;;  %v721_v47 = vld [vmem:[#allocation10 + $0x20] sm:$0xff] }
 0x142   : > { %1267 = vperm.xlu1 %2315, %v1245_v17  }
 0x146   : > { %1272 = vperm.xlu1 %2315, %v1246_v19  }
 0x1a2   : > { %v474_v49 = vpop.xlane.xlu1 %473 }
 0x1a3   : > { %v468_v50 = vpop.xlane.xlu0 %467 }
 0x1a6   : > { %v477_v51 = vpop.xlane.xlu1 %476 }
 0x1a7   : > { %v471_v52 = vpop.xlane.xlu0 %470  ;;  %v2121_v54 = vpack.c.bf16 %v477_v51, %v474_v49 }
 0x1a8   : > { %v2117_v53 = vpack.c.bf16 %v471_v52, %v468_v50  ;;  %v722_v50 = vld [vmem:[#allocation10 + $0x28] sm:$0xff]  ;;  %v723_v52 = vld [vmem:[#allocation10 + $0x30] sm:$0xff] }
 0x1aa   : > { %2118 = vmatprep.subr.bf16.mxu0 %v2117_v53  ;;  %v483_v55 = vpop.xlane.xlu1 %482 }
 0x1ab   : > { %2120 = vmatpush3.bf16.msra.mxu0 %v2117_v53  ;;  %v480_v56 = vpop.xlane.xlu0 %479  ;;  %v724_v53 = vld [vmem:[#allocation10 + $0x38] sm:$0xff] }
 0x1ac   : > { %v2125_v57 = vpack.c.bf16 %v483_v55, %v480_v56  ;;  %2122 = vmatprep.subr.bf16.mxu0 %v2121_v54  ;;  %v2674_v55 = vmov 0.0   ;;  %v1059_v56 = vld [vmem:[%s3044_s10 + $0x8] sm:$0xff] }
 0x1ae   : > { %v489_v58 = vpop.xlane.xlu1 %488 }
 0x1af   : > { %2124 = vmatpush3.bf16.msra.mxu0 %v2121_v54  ;;  %v486_v59 = vpop.xlane.xlu0 %485  ;;  %v1058_v54 = vld [vmem:[%s3044_s10] sm:$0xff] }
 0x1b0   : > { %v2129_v60 = vpack.c.bf16 %v489_v58, %v486_v59  ;;  %2126 = vmatprep.subr.bf16.mxu0 %v2125_v57  ;;  %v1061_v58 = vld [vmem:[%s3044_s10 + $0x18] sm:$0xff] }
 0x1b1   : > { %v1247_v59 = vld [vmem:[#allocation14 + $0x18] sm:$0xff] }
 0x1b2   : > { %v511_v61 = vpop.xlane.xlu1 %510  ;;  %1277 = vperm.xlu1 %2315, %v1247_v59  }
 0x1b3   : > { %2128 = vmatpush3.bf16.msra.mxu0 %v2125_v57  ;;  %v508_v62 = vpop.xlane.xlu0 %507  ;;  %v1060_v57 = vld [vmem:[%s3044_s10 + $0x10] sm:$0xff] }
 0x1b4   : > { %v2133_v63 = vpack.c.bf16 %v511_v61, %v508_v62  ;;  %2130 = vmatprep.subr.bf16.mxu0 %v2129_v60  ;;  %v1249_v61 = vld [vmem:[#allocation14 + $0x28] sm:$0xff]  ;;  %v1250_v62 = vld [vmem:[#allocation14 + $0x30] sm:$0xff] }
 0x1b6   : > { %2134 = vmatprep.subr.bf16.mxu1 %v2133_v63  ;;  %v517_v0 = vpop.xlane.xlu1 %516 }
 0x1b7   : > { %2132 = vmatpush3.bf16.msra.mxu0 %v2129_v60  ;;  %2136 = vmatpush3.bf16.msra.mxu1 %v2133_v63  ;;  %v514_v1 = vpop.xlane.xlu0 %513  ;;  %v1248_v60 = vld [vmem:[#allocation14 + $0x20] sm:$0xff] }
 0x1b8   : > { %v2137_v5 = vpack.c.bf16 %v517_v0, %v514_v1  ;;  %1282 = vperm.xlu1 %2315, %v1248_v60   ;;  %v1244_v63 = vld [vmem:[#allocation14] sm:$0xff]  ;;  %v1251_v0 = vld [vmem:[#allocation14 + $0x38] sm:$0xff]  ;;  %v1253_v1 = vld [vmem:[#allocation14 + $0x48] sm:$0xff] }
 0x1b9   : > { %1262 = vperm.xlu0 %2314, %v1244_v63  }
 0x1ba   : > { %2050 = vmatmul.mubr.msk.f32.vlgmr.msra.gmra.mrb[0].mxu0 %vm534_vm0, %v531_v3  ;;  %2138 = vmatprep.subr.bf16.mxu1 %v2137_v5  ;;  %v523_v7 = vpop.xlane.xlu1 %522 }
 0x1bb   : > { %2140 = vmatpush3.bf16.msra.mxu1 %v2137_v5  ;;  %v520_v10 = vpop.xlane.xlu0 %519  ;;  %2052 = vmatprep.mubr.msk.f32.mxu0 %vm534_vm0, %v532_v6  ;;  %v1255_v5 = vld [vmem:[#allocation14 + $0x58] sm:$0xff] }
 0x1bc   : > { %v2141_v12 = vpack.c.bf16 %v523_v7, %v520_v10  ;;  %1287 = vperm.xlu1 %2315, %v1249_v61   ;;  %v1257_v7 = vld [vmem:[#allocation14 + $0x68] sm:$0xff]  ;;  %v1256_v10 = vld [vmem:[#allocation14 + $0x60] sm:$0xff] }
 0x1bd   : > { %1307 = vperm.xlu0 %2314, %v1253_v1  }
 0x1be   : > { %2053 = vmatmul.mubr.msk.f32.gmra.mrb[2].mxu0 %vm534_vm0, %v533_v11  ;;  %2142 = vmatprep.subr.bf16.mxu1 %v2141_v12  ;;  %v529_v13 = vpop.xlane.xlu1 %528 }
 0x1bf   : > { %2144 = vmatpush3.bf16.msra.mxu1 %v2141_v12  ;;  %v526_v14 = vpop.xlane.xlu0 %525  ;;  %2085 = vmatprep.mubr.msk.f32.mxu0 %vm725_vm1, %v717_v16 }
 0x1c0   : > { %v2145_v15 = vpack.c.bf16 %v529_v13, %v526_v14  ;;  %1292 = vperm.xlu1 %2315, %v1250_v62  }
 0x1c1   : > { %1317 = vperm.xlu0 %2314, %v1255_v5  }
 0x1c2   : > { %2146 = vmatprep.subr.bf16.mxu1 %v2145_v15 }
 0x1c3   : > { %2148 = vmatpush3.bf16.msra.mxu1 %v2145_v15 }
 0x1c4   : > { %1297 = vperm.xlu1 %2315, %v1251_v0  }
 0x1c5   : > { %1327 = vperm.xlu0 %2314, %v1257_v7  }
 0x1c6   : > { %2072 = vmatmul.mubr.msk.f32.vlgmr.msra.gmra.mrb[0].mxu1 %vm534_vm0, %v531_v3  ;;  %v1252_v3 = vld [vmem:[#allocation14 + $0x40] sm:$0xff] }
 0x1c7   : > { %2074 = vmatprep.mubr.msk.f32.mxu1 %vm534_vm0, %v532_v6  ;;  %v1254_v6 = vld [vmem:[#allocation14 + $0x50] sm:$0xff] }
 0x1c8   : > { %1302 = vperm.xlu1 %2315, %v1252_v3  }
 0x1ca   : > { %2075 = vmatmul.mubr.msk.f32.gmra.mrb[2].mxu1 %vm534_vm0, %v533_v11 }
 0x1cb   : > { %2105 = vmatprep.mubr.msk.f32.mxu1 %vm725_vm1, %v717_v16 }
 0x1cc   : > { %1312 = vperm.xlu1 %2315, %v1254_v6  }
 0x1d0   : > { %1322 = vperm.xlu1 %2315, %v1256_v10  }
 0x28d   : > { %v2051_v25 = vpop.f32.mrb[0].mxu0 }
 0x28e   : > { %v613_v28 = vpop.f32.mrb[1].mxu0 }
 0x28f   : > { %v2149_v29 = vpack.c.bf16 %v2051_v25, %v613_v28 }
 0x291   : > { %v2054_v31 = vpop.f32.mrb[2].mxu0  ;;  %2150 = vmatprep.subr.bf16.mxu0 %v2149_v29 }
 0x292   : > { %v623_v34 = vpop.f32.mrb[3].mxu0  ;;  %2152 = vmatpush3.bf16.msra.mxu0 %v2149_v29 }
 0x293   : > { %v2153_v35 = vpack.c.bf16 %v2054_v31, %v623_v34 }
 0x295   : > { %2154 = vmatprep.subr.bf16.mxu0 %v2153_v35 }
 0x296   : > { %2156 = vmatpush3.bf16.msra.mxu0 %v2153_v35 }
 0x297   : > { %2166 = vmatprep.subr.msk.bf16.mxu0 %vm2165_vm4, %v2673_v39  ;;  %vm1089_vm4 = vcmp.eq.s32.totalorder %v1068_v37, %v3112_v30 }
 0x298   : > { %vm2175_vm7 = vmpackc.low %vm1089_vm4, %vm1087_vm3 }
 0x299   : > { %v2073_v41 = vpop.f32.mrb[0].mxu1  ;;  %2086 = vmatmul.mubr.msk.f32.vlgmr.msra.gmra.mrb[4].mxu0 %vm725_vm1, %v718_v38 }
 0x29a   : > { %v698_v44 = vpop.f32.mrb[1].mxu1  ;;  %2168 = vmatpush1.bf16.msk.msra.mxu0 %vm2167_vm9, %v2673_v39  ;;  %2088 = vmatprep.mubr.msk.f32.mxu0 %vm725_vm1, %v719_v40  ;;  %vm1091_vm9 = vcmp.eq.s32.totalorder %v1069_v42, %v3112_v30 }
 0x29b   : > { %v2157_v46 = vpack.c.bf16 %v2073_v41, %v698_v44  ;;  %2170 = vmatprep.subr.msk.bf16.mxu0 %vm2169_vm10, %v2673_v39  ;;  %vm1093_vm10 = vcmp.eq.s32.totalorder %v1070_v43, %v3112_v30 }
 0x29c   : > { %vm2179_vm11 = vmpackc.low %vm1093_vm10, %vm1091_vm9 }
 0x29d   : > { %v2076_v48 = vpop.f32.mrb[2].mxu1  ;;  %2089 = vmatmul.mubr.msk.f32.gmra.mrb[6].mxu0 %vm725_vm1, %v720_v45  ;;  %2158 = vmatprep.subr.bf16.mxu1 %v2157_v46 }
 0x29e   : > { %v708_v49 = vpop.f32.mrb[3].mxu1  ;;  %2160 = vmatpush3.bf16.msra.mxu1 %v2157_v46  ;;  %2172 = vmatpush1.bf16.msk.msra.mxu0 %vm2171_vm15, %v2673_v39 }
 0x29f   : > { %v2161_v51 = vpack.c.bf16 %v2076_v48, %v708_v49  ;;  %2091 = vmatprep.mubr.msk.f32.mxu0 %vm725_vm1, %v721_v47  ;;  %2174 = vmatprep.subr.msk.bf16.mxu0 %vm2173_vm2, %v2673_v39 }
 0x2a1   : > { %2092 = vmatmul.mubr.msk.f32.gmra.mrb[8].mxu0 %vm725_vm1, %v722_v50  ;;  %2162 = vmatprep.subr.bf16.mxu1 %v2161_v51 }
 0x2a2   : > { %2164 = vmatpush3.bf16.msra.mxu1 %v2161_v51  ;;  %2176 = vmatpush1.bf16.msk.msra.mxu0 %vm2175_vm7, %v2673_v39 }
 0x2a3   : > { %2094 = vmatprep.mubr.msk.f32.mxu0 %vm725_vm1, %v723_v52  ;;  %2178 = vmatprep.subr.msk.bf16.mxu0 %vm2177_vm8, %v2673_v39 }
 0x2a5   : > { %2095 = vmatmul.mubr.msk.f32.gmra.mrb[10].mxu0 %vm725_vm1, %v724_v53  ;;  %2106 = vmatmul.mubr.msk.f32.vlgmr.msra.gmra.mrb[4].mxu1 %vm725_vm1, %v718_v38 }
 0x2a6   : > { %2180 = vmatpush1.bf16.msk.msra.mxu0 %vm2179_vm11, %v2673_v39  ;;  %2108 = vmatprep.mubr.msk.f32.mxu1 %vm725_vm1, %v719_v40 }
 0x2a7   : > { %1203 = vmatprep.mubr.f32.mxu0 %v2674_v55 }
 0x2a9   : > { %2109 = vmatmul.mubr.msk.f32.gmra.mrb[6].mxu1 %vm725_vm1, %v720_v45  ;;  %1957 = vmatmul.mubr.msk.f32.vlgmr.msra.gmra.mrb[12].mxu0 %vm534_vm0, %v1058_v54 }
 0x2aa   : > { %2111 = vmatprep.mubr.msk.f32.mxu1 %vm725_vm1, %v721_v47  ;;  %1209 = vmatprep.mubr.f32.mxu0 %v2674_v55 }
 0x2ad   : > { %2112 = vmatmul.mubr.msk.f32.gmra.mrb[8].mxu1 %vm725_vm1, %v722_v50  ;;  %1958 = vmatmul.mubr.msk.f32.gmra.mrb[14].mxu0 %vm534_vm0, %v1059_v56 }
 0x2ae   : > { %2114 = vmatprep.mubr.msk.f32.mxu1 %vm725_vm1, %v723_v52  ;;  %1215 = vmatprep.mubr.f32.mxu0 %v2674_v55 }
 0x2b1   : > { %2115 = vmatmul.mubr.msk.f32.gmra.mrb[10].mxu1 %vm725_vm1, %v724_v53  ;;  %1959 = vmatmul.mubr.msk.f32.gmra.mrb[16].mxu0 %vm534_vm0, %v1060_v57 }
 0x2b2   : > { %1221 = vmatprep.mubr.f32.mxu0 %v2674_v55  ;;  %1488 = vmatprep.mubr.f32.mxu1 %v2674_v55 }
 0x2b5   : > { %1960 = vmatmul.mubr.msk.f32.gmra.mrb[18].mxu0 %vm534_vm0, %v1061_v58 }
 0x2b6   : > { %1452 = vmatprep.mubr.f32.mxu0 %v2674_v55 }
 0x36c   : > { %v2087_v11 = vpop.f32.mrb[4].mxu0 }
 0x36d   : > { %v816_v12 = vpop.f32.mrb[5].mxu0  ;;  %v3150_v16 = vmul.f32 0.001953125, %v2087_v11 }
 0x36e   : > { %v3152_v18 = vmul.f32 0.001953125, %v816_v12 }
 0x36f   : > { %v978_v21 = vmul.f32 %v3150_v16, %v3150_v16 }
 0x370   : > { %v2090_v13 = vpop.f32.mrb[6].mxu0  ;;  %v977_v26 = vmul.f32 %v3152_v18, %v3152_v18 }
 0x371   : > { %v826_v14 = vpop.f32.mrb[7].mxu0  ;;  %v3156_v22 = vmul.f32 0.001953125, %v2090_v13 }
 0x372   : > { %v3160_v27 = vmul.f32 0.001953125, %v826_v14 }
 0x373   : > { %v980_v35 = vmul.f32 %v3156_v22, %v3156_v22 }
 0x374   : > { %v2093_v15 = vpop.f32.mrb[8].mxu0  ;;  %v979_v40 = vmul.f32 %v3160_v27, %v3160_v27 }
 0x375   : > { %v836_v17 = vpop.f32.mrb[9].mxu0  ;;  %v3162_v29 = vmul.f32 0.001953125, %v2093_v15 }
 0x376   : > { %v3164_v30 = vmul.f32 0.001953125, %v836_v17 }
 0x377   : > { %v982_v43 = vmul.f32 %v3162_v29, %v3162_v29 }
 0x378   : > { %v2096_v19 = vpop.f32.mrb[10].mxu0  ;;  %v2107_v20 = vpop.f32.mrb[4].mxu1  ;;  %v981_v44 = vmul.f32 %v3164_v30, %v3164_v30 }
 0x379   : > { %v970_v23 = vmul.f32 0.001953125, %v2107_v20  ;;  %v846_v24 = vpop.f32.mrb[11].mxu0  ;;  %v930_v25 = vpop.f32.mrb[5].mxu1  ;;  %v3174_v47 = vmul.f32 0.001953125, %v2096_v19 }
 0x37a   : > { %v969_v28 = vmul.f32 0.001953125, %v930_v25  ;;  %v3176_v48 = vmul.f32 0.001953125, %v846_v24 }
 0x37b   : > { %v986_v31 = vsub.f32 %v970_v23, %v978_v21  ;;  %v984_v6 = vmul.f32 %v3174_v47, %v3174_v47 }
 0x37c   : > { %v985_v32 = vsub.f32 %v969_v28, %v977_v26  ;;  %v2110_v33 = vpop.f32.mrb[6].mxu1  ;;  %v1205_v34 = vpop.f32.mrb[12].mxu0  ;;  %v983_v13 = vmul.f32 %v3176_v48, %v3176_v48  ;;  %v1018_v28 = vld [vmem:[#allocation8 + $0x8] sm:$0xff] }
 0x37d   : > { %v994_v36 = vmax.f32 %v986_v31, 0.0  ;;  %v972_v37 = vmul.f32 0.001953125, %v2110_v33  ;;  %v940_v38 = vpop.f32.mrb[7].mxu1  ;;  %v1207_v39 = vpop.f32.mrb[13].mxu0  ;;  %v1017_v33 = vld [vmem:[#allocation8] sm:$0xff] }
 0x37e   : > { %v993_v41 = vmax.f32 %v985_v32, 0.0  ;;  %v971_v42 = vmul.f32 0.001953125, %v940_v38 }
 0x37f   : > { %v1002_v45 = vadd.f32 1e-06, %v994_v36  ;;  %v988_v46 = vsub.f32 %v972_v37, %v980_v35 }
 0x380   : > { %v1001_v49 = vadd.f32 1e-06, %v993_v41  ;;  %v987_v50 = vsub.f32 %v971_v42, %v979_v40  ;;  %v2113_v51 = vpop.f32.mrb[8].mxu1  ;;  %v1211_v52 = vpop.f32.mrb[14].mxu0  ;;  %v1228_v40 = vld [vmem:[#allocation13] sm:$0xff]  ;;  %v1234_v41 = vld [vmem:[#allocation13 + $0x30] sm:$0xff] }
 0x381   : > { %2316 = vrsqrt.f32 %v1002_v45  ;;  %v996_v53 = vmax.f32 %v988_v46, 0.0  ;;  %v974_v54 = vmul.f32 0.001953125, %v2113_v51  ;;  %v2183_v56 = vpack.c.bf16 %v1211_v52, %v1205_v34  ;;  %v950_v57 = vpop.f32.mrb[9].mxu1  ;;  %v1213_v58 = vpop.f32.mrb[15].mxu0  ;;  %v1020_v42 = vld [vmem:[#allocation8 + $0x18] sm:$0xff]  ;;  %v1027_v51 = vld [vmem:[#allocation8 + $0x48] sm:$0xff] }
 0x382   : > { %2318 = vrsqrt.f32 %v1001_v49  ;;  %v995_v59 = vmax.f32 %v987_v50, 0.0  ;;  %v973_v60 = vmul.f32 0.001953125, %v950_v57  ;;  %v2181_v61 = vpack.c.bf16 %v1213_v58, %v1207_v39  ;;  %v1021_v57 = vld [vmem:[#allocation8 + $0x20] sm:$0xff] }
 0x383   : > { %v1004_v62 = vadd.f32 1e-06, %v996_v53  ;;  %v990_v63 = vsub.f32 %v974_v54, %v982_v43  ;;  %v1019_v43 = vld [vmem:[#allocation8 + $0x10] sm:$0xff]  ;;  %v1229_v53 = vld [vmem:[#allocation13 + $0x8] sm:$0xff]  ;;  %v1235_v54 = vld [vmem:[#allocation13 + $0x38] sm:$0xff] }
 0x384   : > { %v1003_v0 = vadd.f32 1e-06, %v995_v59  ;;  %v989_v1 = vsub.f32 %v973_v60, %v981_v44  ;;  %v2116_v3 = vpop.f32.mrb[10].mxu1  ;;  %v1217_v5 = vpop.f32.mrb[16].mxu0  ;;  %2182 = vmatprep.subr.bf16.mxu0 %v2181_v61  ;;  %2189 = vmatprep.subr.bf16.mxu1 %v2181_v61 }
 0x385   : > { %2320 = vrsqrt.f32 %v1004_v62  ;;  %v998_v7 = vmax.f32 %v990_v63, 0.0  ;;  %v976_v10 = vmul.f32 0.001953125, %v2116_v3  ;;  %v960_v11 = vpop.f32.mrb[11].mxu1  ;;  %v1219_v12 = vpop.f32.mrb[17].mxu0  ;;  %2184 = vmatpush1.bf16.msra.mxu0 %v2183_v56  ;;  %2191 = vmatpush1.bf16.msra.mxu1 %v2183_v56  ;;  %v1022_v56 = vld [vmem:[#allocation8 + $0x28] sm:$0xff] }
 0x386   : > { %2322 = vrsqrt.f32 %v1003_v0  ;;  %v997_v14 = vmax.f32 %v989_v1, 0.0  ;;  %v975_v15 = vmul.f32 0.001953125, %v960_v11  ;;  %v1230_v0 = vld [vmem:[#allocation13 + $0x10] sm:$0xff]  ;;  %v1236_v1 = vld [vmem:[#allocation13 + $0x40] sm:$0xff] }
 0x387   : > { %v1006_v17 = vadd.f32 1e-06, %v998_v7  ;;  %v992_v19 = vsub.f32 %v976_v10, %v984_v6 }
 0x388   : > { %v1005_v20 = vadd.f32 1e-06, %v997_v14  ;;  %v991_v21 = vsub.f32 %v975_v15, %v983_v13  ;;  %v1223_v23 = vpop.f32.mrb[18].mxu0  ;;  %v1237_v13 = vld [vmem:[#allocation13 + $0x48] sm:$0xff]  ;;  %v1029_v14 = vld [vmem:[#allocation8 + $0x58] sm:$0xff] }
 0x389   : > { %2324 = vrsqrt.f32 %v1006_v17  ;;  %v1000_v24 = vmax.f32 %v992_v19, 0.0  ;;  %v2187_v25 = vpack.c.bf16 %v1223_v23, %v1217_v5  ;;  %v1225_v26 = vpop.f32.mrb[19].mxu0  ;;  %v1023_v5 = vld [vmem:[#allocation8 + $0x30] sm:$0xff] }
 0x38a   : > { %2326 = vrsqrt.f32 %v1005_v20  ;;  %v999_v31 = vmax.f32 %v991_v21, 0.0  ;;  %v2185_v32 = vpack.c.bf16 %v1225_v26, %v1219_v12  ;;  %v1231_v12 = vld [vmem:[#allocation13 + $0x18] sm:$0xff]  ;;  %v1232_v21 = vld [vmem:[#allocation13 + $0x20] sm:$0xff]  ;;  %v1238_v23 = vld [vmem:[#allocation13 + $0x50] sm:$0xff] }
 0x38b   : > { %v2317_v34 = vpop.eup %2316  ;;  %v1008_v35 = vadd.f32 1e-06, %v1000_v24  ;;  %v1031_v24 = vld [vmem:[#allocation8 + $0x68] sm:$0xff] }
 0x38c   : > { %v2319_v36 = vpop.eup %2318  ;;  %v1007_v37 = vadd.f32 1e-06, %v999_v31  ;;  %2186 = vmatprep.subr.bf16.mxu0 %v2185_v32  ;;  %2190 = vmatprep.subr.bf16.mxu1 %v2185_v32  ;;  %v1035_v38 = vmul.f32 %v2317_v34, %v1018_v28  ;;  %v1240_v31 = vld [vmem:[#allocation13 + $0x60] sm:$0xff]  ;;  %v1033_v32 = vld [vmem:[#allocation8 + $0x78] sm:$0xff] }
 0x38d   : > { %2328 = vrsqrt.f32 %v1008_v35  ;;  %2188 = vmatpush1.bf16.msra.mxu0 %v2187_v25  ;;  %2192 = vmatpush1.bf16.msra.mxu1 %v2187_v25  ;;  %v1034_v39 = vmul.f32 %v2319_v36, %v1017_v33  ;;  %v1030_v25 = vld [vmem:[#allocation8 + $0x60] sm:$0xff]  ;;  %v1032_v33 = vld [vmem:[#allocation8 + $0x70] sm:$0xff]  ;;  %v1241_v36 = vld [vmem:[#allocation13 + $0x68] sm:$0xff] }
 0x38e   : > { %2330 = vrsqrt.f32 %v1007_v37  ;;  %1556 = vperm.xlu0 %2314, %v1035_v38   ;;  %v1043_v44 = vmul.f32 %v1035_v38, %v3150_v16  ;;  %v1026_v16 = vld [vmem:[#allocation8 + $0x40] sm:$0xff]  ;;  %v1259_v37 = vld [vmem:[#allocation14 + $0x78] sm:$0xff]  ;;  %v1258_v38 = vld [vmem:[#allocation14 + $0x70] sm:$0xff] }
 0x38f   : > { %v2321_v45 = vpop.eup %2320  ;;  %1551 = vperm.xlu1 %2315, %v1034_v39   ;;  %v1042_v46 = vmul.f32 %v1034_v39, %v3152_v18  ;;  %v1242_v39 = vld [vmem:[#allocation13 + $0x70] sm:$0xff] }
 0x390   : > { %v2323_v49 = vpop.eup %2322  ;;  %1961 = vmatmul.mubr.msk.f32.vlgmr.msra.gmra.mrb[20].mxu0 %vm725_vm1, %v1228_v40  ;;  %1967 = vmatmul.mubr.msk.f32.vlgmr.msra.gmra.mrb[12].mxu1 %vm725_vm1, %v1234_v41  ;;  %v1037_v50 = vmul.f32 %v2321_v45, %v1020_v42  ;;  %v1051_v61 = vsub.f32 %v1027_v51, %v1043_v44  ;;  %v1243_v40 = vld [vmem:[#allocation13 + $0x78] sm:$0xff]  ;;  %v1268_v41 = vpop.permute.xlu1 %1267 }
 0x391   : > { %v1036_v52 = vmul.f32 %v2323_v49, %v1019_v43  ;;  %1458 = vmatprep.mubr.f32.mxu0 %v2674_v55  ;;  %1494 = vmatprep.mubr.f32.mxu1 %v2674_v55  ;;  %v1050_v63 = vsub.f32 %v1026_v16, %v1042_v46 }
 0x392   : > { %1566 = vperm.xlu0 %2314, %v1037_v50   ;;  %v1045_v18 = vmul.f32 %v1037_v50, %v3156_v22  ;;  %v1024_v22 = vld [vmem:[#allocation8 + $0x38] sm:$0xff]  ;;  %v1263_v50 = vpop.permute.xlu0 %1262 }
 0x393   : > { %v2325_v58 = vpop.eup %2324  ;;  %1561 = vperm.xlu1 %2315, %v1036_v52   ;;  %v1044_v59 = vmul.f32 %v1036_v52, %v3160_v27 }
 0x394   : > { %v2327_v60 = vpop.eup %2326  ;;  %1962 = vmatmul.mubr.msk.f32.gmra.mrb[22].mxu0 %vm725_vm1, %v1229_v53  ;;  %1968 = vmatmul.mubr.msk.f32.gmra.mrb[14].mxu1 %vm725_vm1, %v1235_v54  ;;  %v1039_v62 = vmul.f32 %v2325_v58, %v1022_v56  ;;  %v1053_v19 = vsub.f32 %v1029_v14, %v1045_v18  ;;  %v3220_v42 = vpop.permute.xlu1 %1272 }
 0x395   : > { %1464 = vmatprep.mubr.f32.mxu0 %v2674_v55  ;;  %1500 = vmatprep.mubr.f32.mxu1 %v2674_v55  ;;  %v1038_v3 = vmul.f32 %v2327_v60, %v1021_v57 }
 0x396   : > { %1612 = vperm.xlu0 %2314, %v1051_v61   ;;  %v1047_v27 = vmul.f32 %v1039_v62, %v3162_v29  ;;  %v1028_v29 = vld [vmem:[#allocation8 + $0x50] sm:$0xff]  ;;  %v1308_v52 = vpop.permute.xlu0 %1307 }
 0x397   : > { %v2329_v6 = vpop.eup %2328  ;;  %1607 = vperm.xlu1 %2315, %v1050_v63   ;;  %v1046_v7 = vmul.f32 %v1038_v3, %v3164_v30  ;;  %v1052_v20 = vsub.f32 %v1028_v29, %v1044_v59 }
 0x398   : > { %v2331_v10 = vpop.eup %2330  ;;  %1963 = vmatmul.mubr.msk.f32.gmra.mrb[24].mxu0 %vm725_vm1, %v1230_v0  ;;  %1969 = vmatmul.mubr.msk.f32.gmra.mrb[16].mxu1 %vm725_vm1, %v1236_v1  ;;  %v1041_v11 = vmul.f32 %v2329_v6, %v1024_v22  ;;  %v1055_v26 = vsub.f32 %v1031_v24, %v1047_v27  ;;  %v3222_v43 = vpop.permute.xlu1 %1277 }
 0x399   : > { %1470 = vmatprep.mubr.f32.mxu0 %v2674_v55  ;;  %1506 = vmatprep.mubr.f32.mxu1 %v2674_v55  ;;  %v1040_v15 = vmul.f32 %v2331_v10, %v1023_v5  ;;  %v1054_v28 = vsub.f32 %v1030_v25, %v1046_v7 }
 0x39a   : > { %1576 = vperm.xlu0 %2314, %v1039_v62   ;;  %v1049_v17 = vmul.f32 %v1041_v11, %v3174_v47  ;;  %v1233_v47 = vld [vmem:[#allocation13 + $0x28] sm:$0xff]  ;;  %v3234_v53 = vpop.permute.xlu0 %1317 }
 0x39b   : > { %1571 = vperm.xlu1 %2315, %v1038_v3   ;;  %v1048_v30 = vmul.f32 %v1040_v15, %v3176_v48  ;;  %v1239_v48 = vld [vmem:[#allocation13 + $0x58] sm:$0xff] }
 0x39c   : > { %1964 = vmatmul.mubr.msk.f32.gmra.mrb[26].mxu0 %vm725_vm1, %v1231_v12  ;;  %1970 = vmatmul.mubr.msk.f32.gmra.mrb[18].mxu1 %vm725_vm1, %v1237_v13  ;;  %v1057_v34 = vsub.f32 %v1033_v32, %v1049_v17  ;;  %v3224_v44 = vpop.permute.xlu1 %1282 }
 0x39d   : > { %1476 = vmatprep.mubr.f32.mxu0 %v2674_v55  ;;  %1512 = vmatprep.mubr.f32.mxu1 %v2674_v55  ;;  %v1056_v35 = vsub.f32 %v1032_v33, %v1048_v30 }
 0x39e   : > { %1622 = vperm.xlu0 %2314, %v1053_v19   ;;  %v3238_v56 = vpop.permute.xlu0 %1327 }
 0x39f   : > { %1617 = vperm.xlu1 %2315, %v1052_v20  }
 0x3a0   : > { %1965 = vmatmul.mubr.msk.f32.gmra.mrb[28].mxu0 %vm725_vm1, %v1232_v21  ;;  %1971 = vmatmul.mubr.msk.f32.gmra.mrb[20].mxu1 %vm725_vm1, %v1238_v23  ;;  %v3226_v45 = vpop.permute.xlu1 %1287 }
 0x3a1   : > { %1482 = vmatprep.mubr.f32.mxu0 %v2674_v55  ;;  %1518 = vmatprep.mubr.f32.mxu1 %v2674_v55 }
 0x3a2   : > { %1586 = vperm.xlu0 %2314, %v1041_v11  }
 0x3a3   : > { %1581 = vperm.xlu1 %2315, %v1040_v15  }
 0x3a4   : > { %1966 = vmatmul.mubr.msk.f32.gmra.mrb[30].mxu0 %vm725_vm1, %v1233_v47  ;;  %1972 = vmatmul.mubr.msk.f32.gmra.mrb[22].mxu1 %vm725_vm1, %v1239_v48  ;;  %v3228_v46 = vpop.permute.xlu1 %1292 }
 0x3a5   : > { %1524 = vmatprep.mubr.f32.mxu1 %v2674_v55 }
 0x3a6   : > { %1632 = vperm.xlu0 %2314, %v1055_v26  }
 0x3a7   : > { %1627 = vperm.xlu1 %2315, %v1054_v28  }
 0x3a8   : > { %1973 = vmatmul.mubr.msk.f32.gmra.mrb[24].mxu1 %vm725_vm1, %v1240_v31  ;;  %v3230_v49 = vpop.permute.xlu1 %1297 }
 0x3a9   : > { %1530 = vmatprep.mubr.f32.mxu1 %v2674_v55 }
 0x3aa   : > { %1642 = vperm.xlu0 %2314, %v1057_v34  }
 0x3ab   : > { %1637 = vperm.xlu1 %2315, %v1056_v35   ;;  %v2332_v35 = vld [vmem:[%s3036_s2 + $0x20] sm:$0xff] }
 0x3ac   : > { %1974 = vmatmul.mubr.msk.f32.gmra.mrb[26].mxu1 %vm725_vm1, %v1241_v36  ;;  %v1303_v51 = vpop.permute.xlu1 %1302 }
 0x3ad   : > { %1536 = vmatprep.mubr.f32.mxu1 %v2674_v55 }
 0x3ae   : > { %1337 = vperm.xlu0 %2314, %v1259_v37  }
 0x3af   : > { %1332 = vperm.xlu1 %2315, %v1258_v38  }
 0x3b0   : > { %1975 = vmatmul.mubr.msk.f32.gmra.mrb[28].mxu1 %vm725_vm1, %v1242_v39 }
 0x3b1   : > { %1542 = vmatprep.mubr.f32.mxu1 %v2674_v55  ;;  %v3232_v55 = vpop.permute.xlu1 %1312 }
 0x3b4   : > { %1976 = vmatmul.mubr.msk.f32.gmra.mrb[30].mxu1 %vm725_vm1, %v1243_v40 }
 0x3b5   : > { %v3236_v54 = vpop.permute.xlu1 %1322 }
 0x40d   : > { %v1557_v57 = vpop.permute.xlu0 %1556 }
 0x40e   : > { %v1552_v16 = vpop.permute.xlu1 %1551  ;;  %v1591_v30 = vmul.f32 %v1557_v57, %v3079_v8 }
 0x40f   : > { %v1589_v6 = vmul.f32 %v1552_v16, %v3069_v2  ;;  %v1590_v12 = vmul.f32 %v1552_v16, %v3072_v4  ;;  %v1592_v2 = vmul.f32 %v1557_v57, %v3082_v9 }
 0x411   : > { %v3240_v58 = vpop.permute.xlu0 %1566 }
 0x412   : > { %v1562_v18 = vpop.permute.xlu1 %1561 }
 0x413   : > { %v1593_v36 = vmul.f32 %v2332_v35, %v1562_v18 }
 0x415   : > { %v1613_v60 = vpop.permute.xlu0 %1612 }
 0x416   : > { %v1608_v59 = vpop.permute.xlu1 %1607  ;;  %v1647_v4 = vadd.f32 %v1613_v60, %v1591_v30  ;;  %v1648_v32 = vadd.f32 %v1613_v60, %v1592_v2 }
 0x417   : > { %v1645_v14 = vadd.f32 %v1608_v59, %v1589_v6  ;;  %v1646_v15 = vadd.f32 %v1608_v59, %v1590_v12 }
 0x419   : > { %v3248_v3 = vpop.permute.xlu0 %1576 }
 0x41a   : > { %v3242_v61 = vpop.permute.xlu1 %1571 }
 0x41d   : > { %v1623_v26 = vpop.permute.xlu0 %1622 }
 0x41e   : > { %v1618_v22 = vpop.permute.xlu1 %1617 }
 0x41f   : > { %v1649_v59 = vadd.f32 %v1618_v22, %v1593_v36 }
 0x422   : > { %v3258_v28 = vpop.permute.xlu1 %1581 }
 0x463   : > { %v1454_v62 = vpop.f32.mrb[20].mxu0  ;;  %v3244_v63 = vpop.f32.mrb[12].mxu1 }
 0x464   : > { %v1456_v0 = vpop.f32.mrb[21].mxu0  ;;  %v3246_v1 = vpop.f32.mrb[13].mxu1  ;;  %v1455_v7 = vadd.f32 %v1454_v62, %v1263_v50 }
 0x465   : > { %v1457_v13 = vadd.f32 %v1456_v0, %v1263_v50 }
 0x466   : > { %v1661_v19 = vmul.f32 %v1645_v14, %v1455_v7  ;;  %v2334_v7 = vld [vmem:[%s3036_s2 + $0x30] sm:$0xff] }
 0x467   : > { %v1460_v5 = vpop.f32.mrb[22].mxu0  ;;  %v3250_v27 = vpop.f32.mrb[14].mxu1  ;;  %v1662_v48 = vmul.f32 %v1646_v15, %v1457_v13 }
 0x468   : > { %v1462_v10 = vpop.f32.mrb[23].mxu0  ;;  %v3253_v11 = vpop.f32.mrb[15].mxu1  ;;  %v1461_v20 = vadd.f32 %v1460_v5, %v1268_v41 }
 0x469   : > { %v1463_v24 = vadd.f32 %v1462_v10, %v1268_v41  ;;  %v2333_v41 = vld [vmem:[%s3036_s2 + $0x28] sm:$0xff]  ;;  %v1595_v10 = vmul.f32 %v2334_v7, %v3240_v58 }
 0x46a   : > { %v1663_v37 = vmul.f32 %v1647_v4, %v1461_v20  ;;  %v1594_v50 = vmul.f32 %v2333_v41, %v1562_v18  ;;  %v1628_v20 = vpop.permute.xlu1 %1627 }
 0x46b   : > { %v1466_v29 = vpop.f32.mrb[24].mxu0  ;;  %v1502_v17 = vpop.f32.mrb[16].mxu1 }
 0x46c   : > { %v1503_v21 = vadd.f32 %v1502_v17, %v1303_v51  ;;  %v1468_v23 = vpop.f32.mrb[25].mxu0  ;;  %v1504_v47 = vpop.f32.mrb[17].mxu1  ;;  %v1467_v38 = vadd.f32 %v1466_v29, %v3220_v42  ;;  %v1650_v62 = vadd.f32 %v1618_v22, %v1594_v50 }
 0x46d   : > { %v1505_v25 = vadd.f32 %v1504_v47, %v1303_v51  ;;  %v1664_v51 = vmul.f32 %v1648_v32, %v1463_v24  ;;  %v1469_v16 = vadd.f32 %v1468_v23, %v3220_v42  ;;  %v3277_v22 = vpop.permute.xlu0 %1586  ;;  %v2336_v24 = vld [vmem:[%s3036_s2 + $0x40] sm:$0xff]  ;;  %v2337_v32 = vld [vmem:[%s3036_s2 + $0x48] sm:$0xff] }
 0x46e   : > { %v1677_v31 = vadd.f32 %v1661_v19, %v1503_v21  ;;  %v1665_v12 = vmul.f32 %v1649_v59, %v1467_v38  ;;  %v1651_v19 = vadd.f32 %v1623_v26, %v1595_v10 }
 0x46f   : > { %v1678_v8 = vadd.f32 %v1662_v48, %v1505_v25  ;;  %v1472_v33 = vpop.f32.mrb[26].mxu0  ;;  %v1508_v34 = vpop.f32.mrb[18].mxu1  ;;  %v1666_v29 = vmul.f32 %v1650_v62, %v1469_v16  ;;  %v2339_v16 = vld [vmem:[%s3036_s2 + $0x58] sm:$0xff] }
 0x470   : > { %1693 = vst [vmem:[%s3264_s9] sm:$0xff] %v1677_v31  ;;  %v1509_v9 = vadd.f32 %v1508_v34, %v1308_v52  ;;  %v1474_v39 = vpop.f32.mrb[27].mxu0  ;;  %v1510_v40 = vpop.f32.mrb[19].mxu1  ;;  %v1473_v13 = vadd.f32 %v1472_v33, %v3222_v43 }
 0x471   : > { %1694 = vst [vmem:[%s3264_s9 + $0x8] sm:$0xff] %v1678_v8  ;;  %v1511_v57 = vadd.f32 %v1510_v40, %v1308_v52  ;;  %v2335_v52 = vld [vmem:[%s3036_s2 + $0x38] sm:$0xff]  ;;  %v1475_v17 = vadd.f32 %v1474_v39, %v3222_v43  ;;  %v2338_v40 = vld [vmem:[%s3036_s2 + $0x50] sm:$0xff] }
 0x472   : > { %v1679_v60 = vadd.f32 %v1663_v37, %v1509_v9  ;;  %v1596_v15 = vmul.f32 %v2335_v52, %v3240_v58  ;;  %v1597_v58 = vmul.f32 %v2336_v24, %v3242_v61  ;;  %v1667_v25 = vmul.f32 %v1651_v19, %v1473_v13  ;;  %v1633_v37 = vpop.permute.xlu0 %1632 }
 0x473   : > { %v1680_v0 = vadd.f32 %v1664_v51, %v1511_v57  ;;  %v1478_v5 = vpop.f32.mrb[28].mxu0  ;;  %v1514_v6 = vpop.f32.mrb[20].mxu1  ;;  %v1599_v41 = vmul.f32 %v2338_v40, %v3248_v3  ;;  %v1493_v52 = vadd.f32 %v3246_v1, %v3228_v46 }
 0x474   : > { %1695 = vst [vmem:[%s3264_s9 + $0x10] sm:$0xff] %v1679_v60  ;;  %v1515_v18 = vadd.f32 %v1514_v6, %v3232_v55  ;;  %v1480_v42 = vpop.f32.mrb[29].mxu0  ;;  %v1516_v14 = vpop.f32.mrb[21].mxu1  ;;  %v1652_v23 = vadd.f32 %v1623_v26, %v1596_v15  ;;  %v1479_v4 = vadd.f32 %v1478_v5, %v3224_v44  ;;  %v1598_v26 = vmul.f32 %v2337_v32, %v3242_v61 }
 0x475   : > { %1696 = vst [vmem:[%s3264_s9 + $0x18] sm:$0xff] %v1680_v0  ;;  %v1517_v30 = vadd.f32 %v1516_v14, %v3232_v55  ;;  %v1481_v33 = vadd.f32 %v1480_v42, %v3224_v44  ;;  %v1653_v35 = vadd.f32 %v1628_v20, %v1597_v58  ;;  %v1655_v62 = vadd.f32 %v1633_v37, %v1599_v41  ;;  %v1638_v6 = vpop.permute.xlu1 %1637 }
 0x476   : > { %v1681_v21 = vadd.f32 %v1665_v12, %v1515_v18  ;;  %v1668_v8 = vmul.f32 %v1652_v23, %v1475_v17  ;;  %v1654_v38 = vadd.f32 %v1628_v20, %v1598_v26  ;;  %v2340_v12 = vld [vmem:[%s3036_s2 + $0x60] sm:$0xff]  ;;  %v1643_v17 = vpop.permute.xlu0 %1642 }
 0x477   : > { %v1682_v47 = vadd.f32 %v1666_v29, %v1517_v30  ;;  %v1484_v2 = vpop.f32.mrb[30].mxu0  ;;  %v1520_v48 = vpop.f32.mrb[22].mxu1  ;;  %v1669_v50 = vmul.f32 %v1653_v35, %v1479_v4  ;;  %v1601_v13 = vmul.f32 %v2340_v12, %v3258_v28 }
 0x478   : > { %1697 = vst [vmem:[%s3264_s9 + $0x20] sm:$0xff] %v1681_v21  ;;  %v1521_v43 = vadd.f32 %v1520_v48, %v3234_v53  ;;  %v1486_v55 = vpop.f32.mrb[31].mxu0  ;;  %v1522_v31 = vpop.f32.mrb[23].mxu1  ;;  %v1485_v61 = vadd.f32 %v1484_v2, %v3226_v45  ;;  %v1670_v57 = vmul.f32 %v1654_v38, %v1481_v33  ;;  %v2343_v48 = vld [vmem:[%s3036_s2 + $0x78] sm:$0xff] }
 0x479   : > { %1698 = vst [vmem:[%s3264_s9 + $0x28] sm:$0xff] %v1682_v47  ;;  %v1523_v34 = vadd.f32 %v1522_v31, %v3234_v53  ;;  %v1600_v53 = vmul.f32 %v2339_v16, %v3248_v3  ;;  %v1487_v59 = vadd.f32 %v1486_v55, %v3226_v45  ;;  %v1491_v3 = vadd.f32 %v3244_v63, %v3228_v46  ;;  %v1333_v20 = vpop.permute.xlu1 %1332  ;;  %v2342_v47 = vld [vmem:[%s3036_s2 + $0x70] sm:$0xff] }
 0x47a   : > { %v1683_v36 = vadd.f32 %v1667_v25, %v1521_v43  ;;  %v1671_v18 = vmul.f32 %v1655_v62, %v1485_v61  ;;  %v1657_v63 = vadd.f32 %v1638_v6, %v1601_v13  ;;  %v1497_v46 = vadd.f32 %v3250_v27, %v3230_v49  ;;  %v1338_v27 = vpop.permute.xlu0 %1337 }
 0x47b   : > { %v1684_v9 = vadd.f32 %v1668_v8, %v1523_v34  ;;  %v1526_v39 = vpop.f32.mrb[24].mxu1  ;;  %v1656_v5 = vadd.f32 %v1633_v37, %v1600_v53  ;;  %v1604_v24 = vmul.f32 %v2343_v48, %v3277_v22  ;;  %v1499_v25 = vadd.f32 %v3253_v11, %v3230_v49 }
 0x47c   : > { %1699 = vst [vmem:[%s3264_s9 + $0x30] sm:$0xff] %v1683_v36  ;;  %v1527_v44 = vadd.f32 %v1526_v39, %v3236_v54  ;;  %v1528_v51 = vpop.f32.mrb[25].mxu1  ;;  %v1673_v2 = vmul.f32 %v1657_v63, %v1491_v3 }
 0x47d   : > { %1700 = vst [vmem:[%s3264_s9 + $0x38] sm:$0xff] %v1684_v9  ;;  %v1529_v60 = vadd.f32 %v1528_v51, %v3236_v54  ;;  %v2341_v54 = vld [vmem:[%s3036_s2 + $0x68] sm:$0xff]  ;;  %v1672_v15 = vmul.f32 %v1656_v5, %v1487_v59  ;;  %v1660_v31 = vadd.f32 %v1643_v17, %v1604_v24 }
 0x47e   : > { %v1685_v0 = vadd.f32 %v1669_v50, %v1527_v44  ;;  %v1602_v14 = vmul.f32 %v2341_v54, %v3258_v28  ;;  %v1603_v28 = vmul.f32 %v2342_v47, %v3277_v22 }
 0x47f   : > { %v1686_v7 = vadd.f32 %v1670_v57, %v1529_v60  ;;  %v1532_v10 = vpop.f32.mrb[26].mxu1  ;;  %v1676_v49 = vmul.f32 %v1660_v31, %v1499_v25 }
 0x480   : > { %1701 = vst [vmem:[%s3264_s9 + $0x40] sm:$0xff] %v1685_v0  ;;  %v1533_v45 = vadd.f32 %v1532_v10, %v3238_v56  ;;  %v1534_v42 = vpop.f32.mrb[27].mxu1  ;;  %v1658_v19 = vadd.f32 %v1638_v6, %v1602_v14  ;;  %v1659_v43 = vadd.f32 %v1643_v17, %v1603_v28 }
 0x481   : > { %1702 = vst [vmem:[%s3264_s9 + $0x48] sm:$0xff] %v1686_v7  ;;  %v1535_v29 = vadd.f32 %v1534_v42, %v3238_v56 }
 0x482   : > { %v1687_v30 = vadd.f32 %v1671_v18, %v1533_v45  ;;  %v1674_v58 = vmul.f32 %v1658_v19, %v1493_v52  ;;  %v1675_v8 = vmul.f32 %v1659_v43, %v1497_v46 }
 0x483   : > { %v1688_v21 = vadd.f32 %v1672_v15, %v1535_v29  ;;  %v1538_v23 = vpop.f32.mrb[28].mxu1 }
 0x484   : > { %1703 = vst [vmem:[%s3264_s9 + $0x50] sm:$0xff] %v1687_v30  ;;  %v1539_v1 = vadd.f32 %v1538_v23, %v1333_v20  ;;  %v1540_v56 = vpop.f32.mrb[29].mxu1 }
 0x485   : > { %1704 = vst [vmem:[%s3264_s9 + $0x58] sm:$0xff] %v1688_v21  ;;  %v1541_v4 = vadd.f32 %v1540_v56, %v1333_v20 }
 0x486   : > { %v1689_v55 = vadd.f32 %v1673_v2, %v1539_v1 }
 0x487   : > { %v1690_v32 = vadd.f32 %v1674_v58, %v1541_v4  ;;  %v1544_v26 = vpop.f32.mrb[30].mxu1 }
 0x488   : > { %1705 = vst [vmem:[%s3264_s9 + $0x60] sm:$0xff] %v1689_v55  ;;  %v1545_v22 = vadd.f32 %v1544_v26, %v1338_v27  ;;  %v1546_v33 = vpop.f32.mrb[31].mxu1 }
 0x489   : > { %1706 = vst [vmem:[%s3264_s9 + $0x68] sm:$0xff] %v1690_v32  ;;  %v1547_v11 = vadd.f32 %v1546_v33, %v1338_v27 }
 0x48a   : > { %v1691_v34 = vadd.f32 %v1675_v8, %v1545_v22 }
 0x48b   : > { %v1692_v35 = vadd.f32 %v1676_v49, %v1547_v11 }
 0x48c   : > { %1707 = vst [vmem:[%s3264_s9 + $0x70] sm:$0xff] %v1691_v34 }
 0x48d   : > { %1708 = vst [vmem:[%s3264_s9 + $0x78] sm:$0xff] %v1692_v35 }
 0x48e   : > { %2585 = shalt.err (!%p2582_p9)
}
 0x48f   : > { %s2586_s24 = scalar_lea.hbm %s3331_s0, 2048  ;;  %s2590_s2 = scalar_lea.hbm %s3387_s8, 4096 }
 0x490   : > { %p2587_p5 = scmp.ne.s32.totalorder %s3331_s0, %s2586_s24  ;;  %p2591_p1 = scmp.lt.u32.totalorder %s3331_s0, %s3387_s8 }
 0x491   : > { %p2592_p6 = scmp.lt.u32.totalorder %s2590_s2, %s2586_s24  ;;  %p2594_p13 = scmp.lt.u32.totalorder %s2586_s24, %s3331_s0 }
 0x492   : > { %p2588_p7 = pnand %p2587_p5, %p3426_p0 }
 0x493   : > { %p2593_p3 = por %p2592_p6, %p2591_p1 }
 0x494   : > { %p2589_p4 = pneg %p2588_p7 }
 0x495   : > { %p2595_p10 = por %p2594_p13, %p2593_p3 }
 0x497   : > { %p2596_p11 = pnand %p2595_p10, %p2589_p4 }
 0x499   : > { %2599 = shalt.err (!%p2596_p11)
}
 0x49a   : > { %s2676_s12 = smov 256   ;;  %s2677_s10 = smov 16  }
 0x49b   : > { %2221 = dma.vmem_to_hbm [thread:$0]  (%p3426_p0), %s3333_s16, 2048, %s3331_s0, %s1710_s11, %s2676_s12, %s2676_s12, %s2677_s10  }
 0x49c PF: > { %s1738_s9 = sand.u32 1, %s2646_s27   ;;  %p3427_p12 = scmp.ne.s32.totalorder %s3411_s22, 0 }
 0x49d   : > { %p3428_p8 = scmp.ge.s32.totalorder %s2658_s30, 2  ;;  %s1739_s20 = scalar_lea.sflag [#allocation4], %s1738_s9 }
 0x49f   : > { %p2250_p2 = pnand %p3428_p8, %p3427_p12 }
 0x4a1   : > { %2641 = dma.done.wait (!%p2250_p2), %s1739_s20, 2048  }
 0x4a2   : > { %2643 = vsyncadd (!%p2250_p2), %s1739_s20, 4294965248  ;;  %p27_p9 = scmp.ge.s32.totalorder %s2907_s23, 4   ;;  %s3429_s27 = smov %s2650_s28 }
 0x4a3   : > { %s3430_s28 = smov %s2654_s29  ;;  %s3431_s29 = smov %s2918_s13 }
 0x4a4   : > { %s3432_s30 = smov %s2907_s23  ;;  %29 = sbr.rel (!%p27_p9) target bundleno = 17 (0x11), region = 135 }
 0x4ab   :  { %1744 = vsyncpa [#allocation3], 1 }
 0x4ac   :  { %1746 = vsyncpa [#allocation3 + $0x1], 1 }
 0x4ad   :  { %1747 = vsyncpa [#allocation6], 1 }
 0x4ae   :  { %1749 = vsyncpa [#allocation6 + $0x1], 1 }
 0x4af   :  { %1750 = vsyncpa [#allocation9], 1 }
 0x4b0   :  { %1751 = vsyncpa [#allocation12], 1 }
 0x4b1   :  { %1752 = vsyncpa [#allocation15], 1 }
 0x4b2   :  { %1753 = vsyncpa [#allocation4], 1 }
 0x4b3   :  { %1755 = vsyncpa [#allocation4 + $0x1], 1 }

</bundles_post_ra>
